<compile_context>
chip_gen: v6e
topology: v6e:2x2x1
jax: 0.10.0
libtpu: 0.0.40
codegen_flags: <defaults>
</compile_context>

<pallas_src>
import math
import functools

import jax
import jax.numpy as jnp
from jax import lax
from jax.experimental import pallas as pl
from jax.experimental.pallas import tpu as pltpu


def _round_up(x, m):
    return ((x + m - 1) // m) * m


def _largest_divisor_leq(n, cap):
    cap = max(1, min(n, cap))
    for d in range(cap, 0, -1):
        if n % d == 0:
            return d
    return 1


# ---------------------------------------------------------------------------
# Pallas kernel: recurrent part of one LSTM layer.
# grid = (D, NB, NT): direction x batch-block (both "parallel") x time-chunk
# ("arbitrary", the serial recurrence).  Each grid step runs TT timesteps.
# ---------------------------------------------------------------------------
def _lstm_recurrent_kernel(gx_ref, w_hh_ref, h0_ref, c0_ref,
                           y_ref, hn_ref, cn_ref,
                           h_sc, c_sc, *, tt):
    d = pl.program_id(0)           # direction (0 fwd, 1 bwd)
    c_idx = pl.program_id(2)       # time-chunk index
    Hp = h_sc.shape[-1]

    @pl.when(c_idx == 0)
    def _():
        h_sc[...] = h0_ref[...].astype(jnp.float32)
        c_sc[...] = c0_ref[...].astype(jnp.float32)

    w_hh = w_hh_ref[...]           # (Hp, 4Hp) bf16, loaded once per chunk

    def _sigmoid(x):               # 1 EUP op (tanh) instead of exp + reciprocal
        return 0.5 * jnp.tanh(0.5 * x) + 0.5

    def step(s, carry):
        h, c = carry                                   # (BB, Hp) f32 carries
        # forward chunk walks 0..TT-1, reverse chunk walks TT-1..0
        s_eff = s + d * (tt - 1 - 2 * s)
        gates = gx_ref[s_eff].astype(jnp.float32) + jnp.dot(
            h.astype(w_hh.dtype), w_hh, preferred_element_type=jnp.float32)
        # Lane-aligned gate slices (Hp multiple of 128); PyTorch order i, f, g, o
        i_g = _sigmoid(gates[:, 0 * Hp:1 * Hp])
        f_g = _sigmoid(gates[:, 1 * Hp:2 * Hp])
        g_g = jnp.tanh(gates[:, 2 * Hp:3 * Hp])
        o_g = _sigmoid(gates[:, 3 * Hp:4 * Hp])
        c_new = f_g * c + i_g * g_g
        h_new = o_g * jnp.tanh(c_new)
        y_ref[s_eff] = h_new.astype(y_ref.dtype)
        return (h_new, c_new)

    h_fin, c_fin = lax.fori_loop(0, tt, step, (h_sc[...], c_sc[...]),
                                 unroll=True)
    h_sc[...] = h_fin
    c_sc[...] = c_fin

    # Resident outputs: only the final chunk's value matters.
    @pl.when(c_idx == pl.num_programs(2) - 1)
    def _():
        hn_ref[...] = h_fin.astype(hn_ref.dtype)
        cn_ref[...] = c_fin.astype(cn_ref.dtype)


def _lstm_layer_recurrence(gates_x, w_hh_t, h0, c0, *, out_dtype,
                           tt_max=32, pipeline_budget_bytes=24 << 20):
    """gates_x: (D, T, Bp, 4Hp) bf16 (input projection + bias, natural time order),
    w_hh_t: (D, Hp, 4Hp) bf16 (pre-transposed, per-gate padded), h0/c0: (D, Bp, Hp) f32.
    Returns y: (D, T, Bp, Hp) in natural time order, h_n/c_n: (D, Bp, Hp)."""
    D, T, Bp, G = gates_x.shape
    Hp = G // 4

    # Batch split: gives v7x's 2nd TensorCore work when D == 1 (no-op otherwise).
    NB = 2 if (D == 1 and Bp % 16 == 0) else 1
    BB = Bp // NB

    # Time-chunk size: amortize per-grid-step overhead, sized against VMEM,
    # must divide T exactly.
    y_bytes = jnp.dtype(out_dtype).itemsize
    per_step_bytes = BB * Hp * (2 * 4 * 2 + 2 * y_bytes)   # gx (bf16, 2 bufs) + y (2 bufs)
    tt_cap = min(tt_max, max(1, pipeline_budget_bytes // per_step_bytes))
    TT = _largest_divisor_leq(T, tt_cap)
    NT = T // TT

    def gx_map(d, nb, c):
        # reverse direction walks time chunks backwards (scalar arithmetic only)
        return (d, c + d * (NT - 1 - 2 * c), nb, 0)

    def const_map(d, nb, c):
        return (d, nb, 0)

    def whh_map(d, nb, c):
        return (d, 0, 0)

    # Explicit scoped-VMEM limit from the buffer math (+headroom), capped so it
    # stays comfortably within v7x's 64 MiB physical VMEM.
    buf_bytes = (2 * TT * BB * G * 2            # gx, double-buffered, bf16
                 + 2 * TT * BB * Hp * y_bytes   # y, double-buffered
                 + 2 * Hp * G * 2               # W_hh (double-buffered by default)
                 + 8 * BB * Hp * max(y_bytes, 4)  # h0/c0/hn/cn
                 + 2 * BB * Hp * 4)             # f32 scratch carries
    vmem_limit = int(min(max(2 * buf_bytes, 32 << 20), 48 << 20))

    grid_spec = pltpu.PrefetchScalarGridSpec(
        num_scalar_prefetch=0,
        grid=(D, NB, NT),
        in_specs=[
            pl.BlockSpec((None, TT, BB, G), gx_map),
            # TODO(synk): pipeline_mode=pl.Buffered(1) on the three constant-per-
            # direction inputs below would halve their resident VMEM.
            pl.BlockSpec((None, Hp, G), whh_map),      # W_hh^T (resident per dir)
            pl.BlockSpec((None, BB, Hp), const_map),   # h0
            pl.BlockSpec((None, BB, Hp), const_map),   # c0
        ],
        out_specs=[
            pl.BlockSpec((None, TT, BB, Hp), gx_map),  # y (chunk-reversed for bwd)
            pl.BlockSpec((None, BB, Hp), const_map),   # h_n (resident)
            pl.BlockSpec((None, BB, Hp), const_map),   # c_n (resident)
        ],
        scratch_shapes=[
            pltpu.VMEM((BB, Hp), jnp.float32),         # h carry across chunks
            pltpu.VMEM((BB, Hp), jnp.float32),         # c carry across chunks
        ],
    )

    y, h_n, c_n = pl.pallas_call(
        functools.partial(_lstm_recurrent_kernel, tt=TT),
        out_shape=(
            jax.ShapeDtypeStruct((D, T, Bp, Hp), out_dtype),
            jax.ShapeDtypeStruct((D, Bp, Hp), out_dtype),
            jax.ShapeDtypeStruct((D, Bp, Hp), out_dtype),
        ),
        grid_spec=grid_spec,
        compiler_params=pltpu.CompilerParams(
            dimension_semantics=("parallel", "parallel", "arbitrary"),
            vmem_limit_bytes=vmem_limit,
        ),
    )(gates_x, w_hh_t, h0, c0)
    return y, h_n, c_n


# ---------------------------------------------------------------------------
# Weight preparation: transpose once, pad each gate block of H to Hp (x128)
# ---------------------------------------------------------------------------
def _prep_w_hh(w_hh, Hp):
    H = w_hh.shape[1]
    w = jnp.pad(w_hh.reshape(4, H, H), ((0, 0), (0, Hp - H), (0, Hp - H)))
    return jnp.transpose(w, (2, 0, 1)).reshape(Hp, 4 * Hp)


def _prep_w_ih_layer0(w_ih, Hp):
    H = w_ih.shape[0] // 4
    In = w_ih.shape[1]
    w = jnp.pad(w_ih.reshape(4, H, In), ((0, 0), (0, Hp - H), (0, 0)))
    return jnp.transpose(w, (2, 0, 1)).reshape(In, 4 * Hp)


def _prep_w_ih_deep(w_ih, Hp, num_dirs_in):
    # (4H, num_dirs_in*H) -> (num_dirs_in, Hp, 4Hp), padded on both hidden axes
    H = w_ih.shape[0] // 4
    w = w_ih.reshape(4, H, num_dirs_in, H)                 # (gate, out, dir_in, in)
    w = jnp.pad(w, ((0, 0), (0, Hp - H), (0, 0), (0, Hp - H)))
    w = jnp.transpose(w, (2, 3, 0, 1))                     # (dir_in, in, gate, out)
    return w.reshape(num_dirs_in, Hp, 4 * Hp)


def _prep_bias(b_ih, b_hh, Hp):
    H = b_ih.shape[0] // 4
    b = jnp.pad((b_ih + b_hh).reshape(4, H), ((0, 0), (0, Hp - H)))
    return b.reshape(4 * Hp)


# ---------------------------------------------------------------------------
# RNNBase(mode='LSTM') forward
# ---------------------------------------------------------------------------
def rnnbase_lstm_forward(x, params, *, num_layers, bidirectional, hx=None):
    """x: (T, B, input_size).  params: list over (layer, direction) of
    (w_ih, w_hh, b_ih, b_hh).  Returns (output, (h_n, c_n)) with PyTorch shapes:
      output: (T, B, num_dirs*H), h_n/c_n: (num_layers*num_dirs, B, H)."""
    T, B, _ = x.shape
    D = 2 if bidirectional else 1
    H = params[0][1].shape[-1]
    Bp = _round_up(max(B, 8), 8)        # f32 sublane alignment
    Hp = _round_up(H, 128)              # lane-aligned gate blocks
    dtype = x.dtype

    if hx is None:
        h0_all = jnp.zeros((num_layers * D, B, H), dtype)
        c0_all = jnp.zeros((num_layers * D, B, H), dtype)
    else:
        h0_all, c0_all = hx

    # layer-0 input: batch-padded once, bf16 for the MXU input projection
    x_pad = jnp.pad(x, ((0, 0), (0, Bp - B), (0, 0))).astype(jnp.bfloat16)

    y_pad = None                         # previous layer output, (D, T, Bp, Hp), padded
    h_finals, c_finals = [], []
    for layer in range(num_layers):
        dir_params = [params[layer * D + d] for d in range(D)]

        w_hh_t = jnp.stack([_prep_w_hh(p[1], Hp) for p in dir_params]
                           ).astype(jnp.bfloat16)                    # (D, Hp, 4Hp)
        bias = jnp.stack([_prep_bias(p[2], p[3], Hp) for p in dir_params]
                         ).astype(jnp.float32)                       # (D, 4Hp)

        # Hoisted input projection: one bf16 MXU matmul over all timesteps (and
        # both previous-layer directions), f32 accumulate, stored as bf16.
        if layer == 0:
            w_ih_t = jnp.stack([_prep_w_ih_layer0(p[0], Hp) for p in dir_params]
                               ).astype(jnp.bfloat16)                # (D, In, 4Hp)
            gx = jnp.einsum('tbi,dig->dtbg', x_pad, w_ih_t,
                            preferred_element_type=jnp.float32)
        else:
            # Fold the bidirectional concat of the previous layer's padded
            # outputs directly into the projection (no slice/concat/re-pad).
            w_ih_s = jnp.stack([_prep_w_ih_deep(p[0], Hp, D) for p in dir_params],
                               axis=1).astype(jnp.bfloat16)          # (D_in, D, Hp, 4Hp)
            gx = jnp.einsum('etbh,edhg->dtbg', y_pad.astype(jnp.bfloat16), w_ih_s,
                            preferred_element_type=jnp.float32)
        gates_x = (gx + bias[:, None, None, :]).astype(jnp.bfloat16)

        h0 = jnp.pad(h0_all[layer * D:(layer + 1) * D],
                     ((0, 0), (0, Bp - B), (0, Hp - H))).astype(jnp.float32)
        c0 = jnp.pad(c0_all[layer * D:(layer + 1) * D],
                     ((0, 0), (0, Bp - B), (0, Hp - H))).astype(jnp.float32)

        y_pad, hn_pad, cn_pad = _lstm_layer_recurrence(
            gates_x, w_hh_t, h0, c0, out_dtype=dtype)

        for d in range(D):
            h_finals.append(hn_pad[d, :B, :H].astype(dtype))
            c_finals.append(cn_pad[d, :B, :H].astype(dtype))
        # TODO(synk): inter-layer dropout not applied (dropout=0 / eval mode).

    # Slice / concat exactly once, at the very end.
    outs = [y_pad[d, :, :B, :H] for d in range(D)]
    output = (jnp.concatenate(outs, axis=-1) if D == 2 else outs[0]).astype(dtype)
    return output, (jnp.stack(h_finals, 0), jnp.stack(c_finals, 0))


# ---------------------------------------------------------------------------
# Pure-JAX reference (lax.scan, float32) for correctness check
# ---------------------------------------------------------------------------
def _lstm_layer_ref(x, w_ih, w_hh, b_ih, b_hh, h0, c0):
    H = h0.shape[-1]

    def step(carry, xt):
        h, c = carry
        gates = xt @ w_ih.T + h @ w_hh.T + b_ih + b_hh
        i = jax.nn.sigmoid(gates[:, 0 * H:1 * H])
        f = jax.nn.sigmoid(gates[:, 1 * H:2 * H])
        g = jnp.tanh(gates[:, 2 * H:3 * H])
        o = jax.nn.sigmoid(gates[:, 3 * H:4 * H])
        c_new = f * c + i * g
        h_new = o * jnp.tanh(c_new)
        return (h_new, c_new), h_new

    (h_n, c_n), ys = lax.scan(step, (h0, c0), x)
    return ys, h_n, c_n


def rnnbase_lstm_forward_ref(x, params, *, num_layers, bidirectional):
    T, B, _ = x.shape
    D = 2 if bidirectional else 1
    H = params[0][1].shape[-1]
    h0 = jnp.zeros((num_layers * D, B, H), x.dtype)
    c0 = jnp.zeros((num_layers * D, B, H), x.dtype)
    layer_input = x
    h_finals, c_finals = [], []
    for layer in range(num_layers):
        dir_outputs = []
        for direction in range(D):
            idx = layer * D + direction
            w_ih, w_hh, b_ih, b_hh = params[idx]
            inp = layer_input[::-1] if direction == 1 else layer_input
            y, h_n, c_n = _lstm_layer_ref(inp, w_ih, w_hh, b_ih, b_hh,
                                          h0[idx], c0[idx])
            if direction == 1:
                y = y[::-1]
            dir_outputs.append(y)
            h_finals.append(h_n)
            c_finals.append(c_n)
        layer_input = (jnp.concatenate(dir_outputs, axis=-1)
                       if D == 2 else dir_outputs[0])
    return layer_input, (jnp.stack(h_finals, 0), jnp.stack(c_finals, 0))


# ---------------------------------------------------------------------------
# Deterministic parameter init (mirrors RNNBase.reset_parameters)
# ---------------------------------------------------------------------------
def init_lstm_params(key, input_size, hidden_size, num_layers, bidirectional,
                     dtype=jnp.float32):
    num_dirs = 2 if bidirectional else 1
    gate_size = 4 * hidden_size
    stdv = 1.0 / math.sqrt(hidden_size)
    params = []
    for layer in range(num_layers):
        for direction in range(num_dirs):
            layer_input_size = input_size if layer == 0 else hidden_size * num_dirs
            key, k1, k2, k3, k4 = jax.random.split(key, 5)
            w_ih = jax.random.uniform(k1, (gate_size, layer_input_size),
                                      dtype, -stdv, stdv)
            w_hh = jax.random.uniform(k2, (gate_size, hidden_size),
                                      dtype, -stdv, stdv)
            b_ih = jax.random.uniform(k3, (gate_size,), dtype, -stdv, stdv)
            b_hh = jax.random.uniform(k4, (gate_size,), dtype, -stdv, stdv)
            params.append((w_ih, w_hh, b_ih, b_hh))
    return params


if __name__ == "__main__":
    # RNNBase('LSTM', input_size=16, hidden_size=32, num_layers=2,
    #         bias=True, batch_first=False, dropout=0, bidirectional=...)
    INPUT_SIZE, HIDDEN_SIZE, NUM_LAYERS, T, B = 16, 32, 2, 8, 4

    key = jax.random.PRNGKey(0)
    k_x, k_p0, k_p1 = jax.random.split(key, 3)
    x = jax.random.normal(k_x, (T, B, INPUT_SIZE), jnp.float32)

    for bidir, k_p in ((False, k_p0), (True, k_p1)):
        D = 2 if bidir else 1
        params = init_lstm_params(k_p, INPUT_SIZE, HIDDEN_SIZE, NUM_LAYERS, bidir)

        fwd = functools.partial(rnnbase_lstm_forward,
                                num_layers=NUM_LAYERS, bidirectional=bidir)
        output, (h_n, c_n) = fwd(x, params)
        jax.block_until_ready((output, h_n, c_n))

        out_ref, (h_ref, c_ref) = rnnbase_lstm_forward_ref(
            x, params, num_layers=NUM_LAYERS, bidirectional=bidir)

        assert output.shape == (T, B, D * HIDDEN_SIZE)
        assert h_n.shape == (NUM_LAYERS * D, B, HIDDEN_SIZE)
        assert c_n.shape == (NUM_LAYERS * D, B, HIDDEN_SIZE)
        # bf16 gates_x / bf16 matmuls (f32 carries) -> looser tolerance than pure f32
        assert jnp.allclose(output, out_ref, atol=5e-2, rtol=5e-2), \
            float(jnp.max(jnp.abs(output - out_ref)))
        assert jnp.allclose(h_n, h_ref, atol=5e-2, rtol=5e-2)
        assert jnp.allclose(c_n, c_ref, atol=5e-2, rtol=5e-2)

    print("KERNEL_OK")
</pallas_src>

<mosaic_0001>
module attributes {stable_mosaic.version = 11 : i64} {
  func.func @_lstm_recurrent_kernel(%arg0: i32, %arg1: i32, %arg2: i32, %arg3: memref<1x8x8x512xbf16, #tpu.memory_space<vmem>>, %arg4: memref<1x128x512xbf16, #tpu.memory_space<vmem>>, %arg5: memref<1x8x128xf32, #tpu.memory_space<vmem>>, %arg6: memref<1x8x128xf32, #tpu.memory_space<vmem>>, %arg7: memref<1x8x8x128xf32, #tpu.memory_space<vmem>>, %arg8: memref<1x8x128xf32, #tpu.memory_space<vmem>>, %arg9: memref<1x8x128xf32, #tpu.memory_space<vmem>>, %arg10: memref<8x128xf32, #tpu.memory_space<vmem>>, %arg11: memref<8x128xf32, #tpu.memory_space<vmem>>) attributes {dimension_semantics = [#tpu.dimension_semantics<parallel>, #tpu.dimension_semantics<parallel>, #tpu.dimension_semantics<arbitrary>], iteration_bounds = array<i64: 1, 1, 1>, scalar_prefetch = 0 : i64, scratch_operands = 2 : i64, tpu.core_type = #tpu.core_type<tc>, window_params = [{transform_indices = @transform_0, window_bounds = array<i64: 1, 8, 8, 512>}, {transform_indices = @transform_1, window_bounds = array<i64: 1, 128, 512>}, {transform_indices = @transform_2, window_bounds = array<i64: 1, 8, 128>}, {transform_indices = @transform_3, window_bounds = array<i64: 1, 8, 128>}, {transform_indices = @transform_4, window_bounds = array<i64: 1, 8, 8, 128>}, {transform_indices = @transform_5, window_bounds = array<i64: 1, 8, 128>}, {transform_indices = @transform_6, window_bounds = array<i64: 1, 8, 128>}]} {
    %c0_i32 = arith.constant 0 : i32
    %0 = arith.cmpi eq, %arg2, %c0_i32 : i32
    %1 = arith.extui %0 : i1 to i32
    %c0_i32_0 = arith.constant 0 : i32
    %2 = arith.cmpi ne, %1, %c0_i32_0 : i32
    scf.if %2 {
      %c0_157 = arith.constant 0 : index
      %c0_158 = arith.constant 0 : index
      %c0_159 = arith.constant 0 : index
      %380 = vector.load %arg5[%c0_157, %c0_158, %c0_159] : memref<1x8x128xf32, #tpu.memory_space<vmem>>, vector<1x8x128xf32>
      %381 = vector.shape_cast %380 : vector<1x8x128xf32> to vector<8x128xf32>
      %c0_160 = arith.constant 0 : index
      %c0_161 = arith.constant 0 : index
      %382 = vector.load %arg10[%c0_160, %c0_161] : memref<8x128xf32, #tpu.memory_space<vmem>>, vector<8x128xf32>
      tpu.vector_store %arg10[%c0_160, %c0_161], %381 {strides = array<i32>} : memref<8x128xf32, #tpu.memory_space<vmem>>, vector<8x128xf32>,
      %c0_162 = arith.constant 0 : index
      %c0_163 = arith.constant 0 : index
      %c0_164 = arith.constant 0 : index
      %383 = vector.load %arg6[%c0_162, %c0_163, %c0_164] : memref<1x8x128xf32, #tpu.memory_space<vmem>>, vector<1x8x128xf32>
      %384 = vector.shape_cast %383 : vector<1x8x128xf32> to vector<8x128xf32>
      %c0_165 = arith.constant 0 : index
      %c0_166 = arith.constant 0 : index
      %385 = vector.load %arg11[%c0_165, %c0_166] : memref<8x128xf32, #tpu.memory_space<vmem>>, vector<8x128xf32>
      tpu.vector_store %arg11[%c0_165, %c0_166], %384 {strides = array<i32>} : memref<8x128xf32, #tpu.memory_space<vmem>>, vector<8x128xf32>,
    } else {
    }
    %c0 = arith.constant 0 : index
    %c0_1 = arith.constant 0 : index
    %c0_2 = arith.constant 0 : index
    %3 = vector.load %arg4[%c0, %c0_1, %c0_2] : memref<1x128x512xbf16, #tpu.memory_space<vmem>>, vector<1x128x512xbf16>
    %4 = vector.shape_cast %3 : vector<1x128x512xbf16> to vector<128x512xbf16>
    %c0_3 = arith.constant 0 : index
    %c0_4 = arith.constant 0 : index
    %5 = vector.load %arg10[%c0_3, %c0_4] : memref<8x128xf32, #tpu.memory_space<vmem>>, vector<8x128xf32>
    %c0_5 = arith.constant 0 : index
    %c0_6 = arith.constant 0 : index
    %6 = vector.load %arg11[%c0_5, %c0_6] : memref<8x128xf32, #tpu.memory_space<vmem>>, vector<8x128xf32>
    %c0_i32_7 = arith.constant 0 : i32
    %c2_i32 = arith.constant 2 : i32
    %7 = arith.muli %c2_i32, %c0_i32_7 : i32
    %c7_i32 = arith.constant 7 : i32
    %8 = arith.subi %c7_i32, %7 : i32
    %9 = arith.muli %arg0, %8 : i32
    %10 = arith.addi %c0_i32_7, %9 : i32
    %c0_8 = arith.constant 0 : index
    %11 = arith.index_cast %10 : i32 to index
    %c0_9 = arith.constant 0 : index
    %c0_10 = arith.constant 0 : index
    %12 = vector.load %arg3[%c0_8, %11, %c0_9, %c0_10] : memref<1x8x8x512xbf16, #tpu.memory_space<vmem>>, vector<1x1x8x512xbf16>
    %13 = vector.shape_cast %12 : vector<1x1x8x512xbf16> to vector<8x512xbf16>
    %14 = arith.extf %13 : vector<8x512xbf16> to vector<8x512xf32>
    %15 = arith.truncf %5 : vector<8x128xf32> to vector<8x128xbf16>
    %cst = arith.constant dense<0.000000e+00> : vector<8x512xf32>
    %16 = tpu.matmul %15, %4, %cst {dimension_numbers = #tpu.dot_dimension_numbers<[1], [0], [0], [1], [0, 0, 1, 1], [], []>} : vector<8x128xbf16>, vector<128x512xbf16>, vector<8x512xf32> -> vector<8x512xf32>
    %17 = arith.addf %14, %16 : vector<8x512xf32>
    %18 = vector.extract_strided_slice %17 {offsets = [0, 0], sizes = [8, 128], strides = [1, 1]} : vector<8x512xf32> to vector<8x128xf32>
    %cst_11 = arith.constant 5.000000e-01 : f32
    %19 = vector.broadcast %cst_11 : f32 to vector<8x128xf32>
    %20 = arith.mulf %19, %18 : vector<8x128xf32>
    %21 = math.tanh %20 : vector<8x128xf32>
    %cst_12 = arith.constant 5.000000e-01 : f32
    %22 = vector.broadcast %cst_12 : f32 to vector<8x128xf32>
    %23 = arith.mulf %22, %21 : vector<8x128xf32>
    %cst_13 = arith.constant 5.000000e-01 : f32
    %24 = vector.broadcast %cst_13 : f32 to vector<8x128xf32>
    %25 = arith.addf %23, %24 : vector<8x128xf32>
    %26 = vector.extract_strided_slice %17 {offsets = [0, 128], sizes = [8, 128], strides = [1, 1]} : vector<8x512xf32> to vector<8x128xf32>
    %cst_14 = arith.constant 5.000000e-01 : f32
    %27 = vector.broadcast %cst_14 : f32 to vector<8x128xf32>
    %28 = arith.mulf %27, %26 : vector<8x128xf32>
    %29 = math.tanh %28 : vector<8x128xf32>
    %cst_15 = arith.constant 5.000000e-01 : f32
    %30 = vector.broadcast %cst_15 : f32 to vector<8x128xf32>
    %31 = arith.mulf %30, %29 : vector<8x128xf32>
    %cst_16 = arith.constant 5.000000e-01 : f32
    %32 = vector.broadcast %cst_16 : f32 to vector<8x128xf32>
    %33 = arith.addf %31, %32 : vector<8x128xf32>
    %34 = vector.extract_strided_slice %17 {offsets = [0, 256], sizes = [8, 128], strides = [1, 1]} : vector<8x512xf32> to vector<8x128xf32>
    %35 = math.tanh %34 : vector<8x128xf32>
    %36 = vector.extract_strided_slice %17 {offsets = [0, 384], sizes = [8, 128], strides = [1, 1]} : vector<8x512xf32> to vector<8x128xf32>
    %cst_17 = arith.constant 5.000000e-01 : f32
    %37 = vector.broadcast %cst_17 : f32 to vector<8x128xf32>
    %38 = arith.mulf %37, %36 : vector<8x128xf32>
    %39 = math.tanh %38 : vector<8x128xf32>
    %cst_18 = arith.constant 5.000000e-01 : f32
    %40 = vector.broadcast %cst_18 : f32 to vector<8x128xf32>
    %41 = arith.mulf %40, %39 : vector<8x128xf32>
    %cst_19 = arith.constant 5.000000e-01 : f32
    %42 = vector.broadcast %cst_19 : f32 to vector<8x128xf32>
    %43 = arith.addf %41, %42 : vector<8x128xf32>
    %44 = arith.mulf %33, %6 : vector<8x128xf32>
    %45 = arith.mulf %25, %35 : vector<8x128xf32>
    %46 = arith.addf %44, %45 : vector<8x128xf32>
    %47 = math.tanh %46 : vector<8x128xf32>
    %48 = arith.mulf %43, %47 : vector<8x128xf32>
    %c0_20 = arith.constant 0 : index
    %49 = arith.index_cast %10 : i32 to index
    %c0_21 = arith.constant 0 : index
    %c0_22 = arith.constant 0 : index
    %50 = vector.load %arg7[%c0_20, %49, %c0_21, %c0_22] : memref<1x8x8x128xf32, #tpu.memory_space<vmem>>, vector<1x1x8x128xf32>
    %51 = vector.shape_cast %50 : vector<1x1x8x128xf32> to vector<8x128xf32>
    %52 = vector.shape_cast %48 : vector<8x128xf32> to vector<1x1x8x128xf32>
    tpu.vector_store %arg7[%c0_20, %49, %c0_21, %c0_22], %52 {strides = array<i32>} : memref<1x8x8x128xf32, #tpu.memory_space<vmem>>, vector<1x1x8x128xf32>,
    %c1_i32 = arith.constant 1 : i32
    %c2_i32_23 = arith.constant 2 : i32
    %53 = arith.muli %c2_i32_23, %c1_i32 : i32
    %c7_i32_24 = arith.constant 7 : i32
    %54 = arith.subi %c7_i32_24, %53 : i32
    %55 = arith.muli %arg0, %54 : i32
    %56 = arith.addi %c1_i32, %55 : i32
    %c0_25 = arith.constant 0 : index
    %57 = arith.index_cast %56 : i32 to index
    %c0_26 = arith.constant 0 : index
    %c0_27 = arith.constant 0 : index
    %58 = vector.load %arg3[%c0_25, %57, %c0_26, %c0_27] : memref<1x8x8x512xbf16, #tpu.memory_space<vmem>>, vector<1x1x8x512xbf16>
    %59 = vector.shape_cast %58 : vector<1x1x8x512xbf16> to vector<8x512xbf16>
    %60 = arith.extf %59 : vector<8x512xbf16> to vector<8x512xf32>
    %61 = arith.truncf %48 : vector<8x128xf32> to vector<8x128xbf16>
    %cst_28 = arith.constant dense<0.000000e+00> : vector<8x512xf32>
    %62 = tpu.matmul %61, %4, %cst_28 {dimension_numbers = #tpu.dot_dimension_numbers<[1], [0], [0], [1], [0, 0, 1, 1], [], []>} : vector<8x128xbf16>, vector<128x512xbf16>, vector<8x512xf32> -> vector<8x512xf32>
    %63 = arith.addf %60, %62 : vector<8x512xf32>
    %64 = vector.extract_strided_slice %63 {offsets = [0, 0], sizes = [8, 128], strides = [1, 1]} : vector<8x512xf32> to vector<8x128xf32>
    %cst_29 = arith.constant 5.000000e-01 : f32
    %65 = vector.broadcast %cst_29 : f32 to vector<8x128xf32>
    %66 = arith.mulf %65, %64 : vector<8x128xf32>
    %67 = math.tanh %66 : vector<8x128xf32>
    %cst_30 = arith.constant 5.000000e-01 : f32
    %68 = vector.broadcast %cst_30 : f32 to vector<8x128xf32>
    %69 = arith.mulf %68, %67 : vector<8x128xf32>
    %cst_31 = arith.constant 5.000000e-01 : f32
    %70 = vector.broadcast %cst_31 : f32 to vector<8x128xf32>
    %71 = arith.addf %69, %70 : vector<8x128xf32>
    %72 = vector.extract_strided_slice %63 {offsets = [0, 128], sizes = [8, 128], strides = [1, 1]} : vector<8x512xf32> to vector<8x128xf32>
    %cst_32 = arith.constant 5.000000e-01 : f32
    %73 = vector.broadcast %cst_32 : f32 to vector<8x128xf32>
    %74 = arith.mulf %73, %72 : vector<8x128xf32>
    %75 = math.tanh %74 : vector<8x128xf32>
    %cst_33 = arith.constant 5.000000e-01 : f32
    %76 = vector.broadcast %cst_33 : f32 to vector<8x128xf32>
    %77 = arith.mulf %76, %75 : vector<8x128xf32>
    %cst_34 = arith.constant 5.000000e-01 : f32
    %78 = vector.broadcast %cst_34 : f32 to vector<8x128xf32>
    %79 = arith.addf %77, %78 : vector<8x128xf32>
    %80 = vector.extract_strided_slice %63 {offsets = [0, 256], sizes = [8, 128], strides = [1, 1]} : vector<8x512xf32> to vector<8x128xf32>
    %81 = math.tanh %80 : vector<8x128xf32>
    %82 = vector.extract_strided_slice %63 {offsets = [0, 384], sizes = [8, 128], strides = [1, 1]} : vector<8x512xf32> to vector<8x128xf32>
    %cst_35 = arith.constant 5.000000e-01 : f32
    %83 = vector.broadcast %cst_35 : f32 to vector<8x128xf32>
    %84 = arith.mulf %83, %82 : vector<8x128xf32>
    %85 = math.tanh %84 : vector<8x128xf32>
    %cst_36 = arith.constant 5.000000e-01 : f32
    %86 = vector.broadcast %cst_36 : f32 to vector<8x128xf32>
    %87 = arith.mulf %86, %85 : vector<8x128xf32>
    %cst_37 = arith.constant 5.000000e-01 : f32
    %88 = vector.broadcast %cst_37 : f32 to vector<8x128xf32>
    %89 = arith.addf %87, %88 : vector<8x128xf32>
    %90 = arith.mulf %79, %46 : vector<8x128xf32>
    %91 = arith.mulf %71, %81 : vector<8x128xf32>
    %92 = arith.addf %90, %91 : vector<8x128xf32>
    %93 = math.tanh %92 : vector<8x128xf32>
    %94 = arith.mulf %89, %93 : vector<8x128xf32>
    %c0_38 = arith.constant 0 : index
    %95 = arith.index_cast %56 : i32 to index
    %c0_39 = arith.constant 0 : index
    %c0_40 = arith.constant 0 : index
    %96 = vector.load %arg7[%c0_38, %95, %c0_39, %c0_40] : memref<1x8x8x128xf32, #tpu.memory_space<vmem>>, vector<1x1x8x128xf32>
    %97 = vector.shape_cast %96 : vector<1x1x8x128xf32> to vector<8x128xf32>
    %98 = vector.shape_cast %94 : vector<8x128xf32> to vector<1x1x8x128xf32>
    tpu.vector_store %arg7[%c0_38, %95, %c0_39, %c0_40], %98 {strides = array<i32>} : memref<1x8x8x128xf32, #tpu.memory_space<vmem>>, vector<1x1x8x128xf32>,
    %c2_i32_41 = arith.constant 2 : i32
    %c2_i32_42 = arith.constant 2 : i32
    %99 = arith.muli %c2_i32_42, %c2_i32_41 : i32
    %c7_i32_43 = arith.constant 7 : i32
    %100 = arith.subi %c7_i32_43, %99 : i32
    %101 = arith.muli %arg0, %100 : i32
    %102 = arith.addi %c2_i32_41, %101 : i32
    %c0_44 = arith.constant 0 : index
    %103 = arith.index_cast %102 : i32 to index
    %c0_45 = arith.constant 0 : index
    %c0_46 = arith.constant 0 : index
    %104 = vector.load %arg3[%c0_44, %103, %c0_45, %c0_46] : memref<1x8x8x512xbf16, #tpu.memory_space<vmem>>, vector<1x1x8x512xbf16>
    %105 = vector.shape_cast %104 : vector<1x1x8x512xbf16> to vector<8x512xbf16>
    %106 = arith.extf %105 : vector<8x512xbf16> to vector<8x512xf32>
    %107 = arith.truncf %94 : vector<8x128xf32> to vector<8x128xbf16>
    %cst_47 = arith.constant dense<0.000000e+00> : vector<8x512xf32>
    %108 = tpu.matmul %107, %4, %cst_47 {dimension_numbers = #tpu.dot_dimension_numbers<[1], [0], [0], [1], [0, 0, 1, 1], [], []>} : vector<8x128xbf16>, vector<128x512xbf16>, vector<8x512xf32> -> vector<8x512xf32>
    %109 = arith.addf %106, %108 : vector<8x512xf32>
    %110 = vector.extract_strided_slice %109 {offsets = [0, 0], sizes = [8, 128], strides = [1, 1]} : vector<8x512xf32> to vector<8x128xf32>
    %cst_48 = arith.constant 5.000000e-01 : f32
    %111 = vector.broadcast %cst_48 : f32 to vector<8x128xf32>
    %112 = arith.mulf %111, %110 : vector<8x128xf32>
    %113 = math.tanh %112 : vector<8x128xf32>
    %cst_49 = arith.constant 5.000000e-01 : f32
    %114 = vector.broadcast %cst_49 : f32 to vector<8x128xf32>
    %115 = arith.mulf %114, %113 : vector<8x128xf32>
    %cst_50 = arith.constant 5.000000e-01 : f32
    %116 = vector.broadcast %cst_50 : f32 to vector<8x128xf32>
    %117 = arith.addf %115, %116 : vector<8x128xf32>
    %118 = vector.extract_strided_slice %109 {offsets = [0, 128], sizes = [8, 128], strides = [1, 1]} : vector<8x512xf32> to vector<8x128xf32>
    %cst_51 = arith.constant 5.000000e-01 : f32
    %119 = vector.broadcast %cst_51 : f32 to vector<8x128xf32>
    %120 = arith.mulf %119, %118 : vector<8x128xf32>
    %121 = math.tanh %120 : vector<8x128xf32>
    %cst_52 = arith.constant 5.000000e-01 : f32
    %122 = vector.broadcast %cst_52 : f32 to vector<8x128xf32>
    %123 = arith.mulf %122, %121 : vector<8x128xf32>
    %cst_53 = arith.constant 5.000000e-01 : f32
    %124 = vector.broadcast %cst_53 : f32 to vector<8x128xf32>
    %125 = arith.addf %123, %124 : vector<8x128xf32>
    %126 = vector.extract_strided_slice %109 {offsets = [0, 256], sizes = [8, 128], strides = [1, 1]} : vector<8x512xf32> to vector<8x128xf32>
    %127 = math.tanh %126 : vector<8x128xf32>
    %128 = vector.extract_strided_slice %109 {offsets = [0, 384], sizes = [8, 128], strides = [1, 1]} : vector<8x512xf32> to vector<8x128xf32>
    %cst_54 = arith.constant 5.000000e-01 : f32
    %129 = vector.broadcast %cst_54 : f32 to vector<8x128xf32>
    %130 = arith.mulf %129, %128 : vector<8x128xf32>
    %131 = math.tanh %130 : vector<8x128xf32>
    %cst_55 = arith.constant 5.000000e-01 : f32
    %132 = vector.broadcast %cst_55 : f32 to vector<8x128xf32>
    %133 = arith.mulf %132, %131 : vector<8x128xf32>
    %cst_56 = arith.constant 5.000000e-01 : f32
    %134 = vector.broadcast %cst_56 : f32 to vector<8x128xf32>
    %135 = arith.addf %133, %134 : vector<8x128xf32>
    %136 = arith.mulf %125, %92 : vector<8x128xf32>
    %137 = arith.mulf %117, %127 : vector<8x128xf32>
    %138 = arith.addf %136, %137 : vector<8x128xf32>
    %139 = math.tanh %138 : vector<8x128xf32>
    %140 = arith.mulf %135, %139 : vector<8x128xf32>
    %c0_57 = arith.constant 0 : index
    %141 = arith.index_cast %102 : i32 to index
    %c0_58 = arith.constant 0 : index
    %c0_59 = arith.constant 0 : index
    %142 = vector.load %arg7[%c0_57, %141, %c0_58, %c0_59] : memref<1x8x8x128xf32, #tpu.memory_space<vmem>>, vector<1x1x8x128xf32>
    %143 = vector.shape_cast %142 : vector<1x1x8x128xf32> to vector<8x128xf32>
    %144 = vector.shape_cast %140 : vector<8x128xf32> to vector<1x1x8x128xf32>
    tpu.vector_store %arg7[%c0_57, %141, %c0_58, %c0_59], %144 {strides = array<i32>} : memref<1x8x8x128xf32, #tpu.memory_space<vmem>>, vector<1x1x8x128xf32>,
    %c3_i32 = arith.constant 3 : i32
    %c2_i32_60 = arith.constant 2 : i32
    %145 = arith.muli %c2_i32_60, %c3_i32 : i32
    %c7_i32_61 = arith.constant 7 : i32
    %146 = arith.subi %c7_i32_61, %145 : i32
    %147 = arith.muli %arg0, %146 : i32
    %148 = arith.addi %c3_i32, %147 : i32
    %c0_62 = arith.constant 0 : index
    %149 = arith.index_cast %148 : i32 to index
    %c0_63 = arith.constant 0 : index
    %c0_64 = arith.constant 0 : index
    %150 = vector.load %arg3[%c0_62, %149, %c0_63, %c0_64] : memref<1x8x8x512xbf16, #tpu.memory_space<vmem>>, vector<1x1x8x512xbf16>
    %151 = vector.shape_cast %150 : vector<1x1x8x512xbf16> to vector<8x512xbf16>
    %152 = arith.extf %151 : vector<8x512xbf16> to vector<8x512xf32>
    %153 = arith.truncf %140 : vector<8x128xf32> to vector<8x128xbf16>
    %cst_65 = arith.constant dense<0.000000e+00> : vector<8x512xf32>
    %154 = tpu.matmul %153, %4, %cst_65 {dimension_numbers = #tpu.dot_dimension_numbers<[1], [0], [0], [1], [0, 0, 1, 1], [], []>} : vector<8x128xbf16>, vector<128x512xbf16>, vector<8x512xf32> -> vector<8x512xf32>
    %155 = arith.addf %152, %154 : vector<8x512xf32>
    %156 = vector.extract_strided_slice %155 {offsets = [0, 0], sizes = [8, 128], strides = [1, 1]} : vector<8x512xf32> to vector<8x128xf32>
    %cst_66 = arith.constant 5.000000e-01 : f32
    %157 = vector.broadcast %cst_66 : f32 to vector<8x128xf32>
    %158 = arith.mulf %157, %156 : vector<8x128xf32>
    %159 = math.tanh %158 : vector<8x128xf32>
    %cst_67 = arith.constant 5.000000e-01 : f32
    %160 = vector.broadcast %cst_67 : f32 to vector<8x128xf32>
    %161 = arith.mulf %160, %159 : vector<8x128xf32>
    %cst_68 = arith.constant 5.000000e-01 : f32
    %162 = vector.broadcast %cst_68 : f32 to vector<8x128xf32>
    %163 = arith.addf %161, %162 : vector<8x128xf32>
    %164 = vector.extract_strided_slice %155 {offsets = [0, 128], sizes = [8, 128], strides = [1, 1]} : vector<8x512xf32> to vector<8x128xf32>
    %cst_69 = arith.constant 5.000000e-01 : f32
    %165 = vector.broadcast %cst_69 : f32 to vector<8x128xf32>
    %166 = arith.mulf %165, %164 : vector<8x128xf32>
    %167 = math.tanh %166 : vector<8x128xf32>
    %cst_70 = arith.constant 5.000000e-01 : f32
    %168 = vector.broadcast %cst_70 : f32 to vector<8x128xf32>
    %169 = arith.mulf %168, %167 : vector<8x128xf32>
    %cst_71 = arith.constant 5.000000e-01 : f32
    %170 = vector.broadcast %cst_71 : f32 to vector<8x128xf32>
    %171 = arith.addf %169, %170 : vector<8x128xf32>
    %172 = vector.extract_strided_slice %155 {offsets = [0, 256], sizes = [8, 128], strides = [1, 1]} : vector<8x512xf32> to vector<8x128xf32>
    %173 = math.tanh %172 : vector<8x128xf32>
    %174 = vector.extract_strided_slice %155 {offsets = [0, 384], sizes = [8, 128], strides = [1, 1]} : vector<8x512xf32> to vector<8x128xf32>
    %cst_72 = arith.constant 5.000000e-01 : f32
    %175 = vector.broadcast %cst_72 : f32 to vector<8x128xf32>
    %176 = arith.mulf %175, %174 : vector<8x128xf32>
    %177 = math.tanh %176 : vector<8x128xf32>
    %cst_73 = arith.constant 5.000000e-01 : f32
    %178 = vector.broadcast %cst_73 : f32 to vector<8x128xf32>
    %179 = arith.mulf %178, %177 : vector<8x128xf32>
    %cst_74 = arith.constant 5.000000e-01 : f32
    %180 = vector.broadcast %cst_74 : f32 to vector<8x128xf32>
    %181 = arith.addf %179, %180 : vector<8x128xf32>
    %182 = arith.mulf %171, %138 : vector<8x128xf32>
    %183 = arith.mulf %163, %173 : vector<8x128xf32>
    %184 = arith.addf %182, %183 : vector<8x128xf32>
    %185 = math.tanh %184 : vector<8x128xf32>
    %186 = arith.mulf %181, %185 : vector<8x128xf32>
    %c0_75 = arith.constant 0 : index
    %187 = arith.index_cast %148 : i32 to index
    %c0_76 = arith.constant 0 : index
    %c0_77 = arith.constant 0 : index
    %188 = vector.load %arg7[%c0_75, %187, %c0_76, %c0_77] : memref<1x8x8x128xf32, #tpu.memory_space<vmem>>, vector<1x1x8x128xf32>
    %189 = vector.shape_cast %188 : vector<1x1x8x128xf32> to vector<8x128xf32>
    %190 = vector.shape_cast %186 : vector<8x128xf32> to vector<1x1x8x128xf32>
    tpu.vector_store %arg7[%c0_75, %187, %c0_76, %c0_77], %190 {strides = array<i32>} : memref<1x8x8x128xf32, #tpu.memory_space<vmem>>, vector<1x1x8x128xf32>,
    %c4_i32 = arith.constant 4 : i32
    %c2_i32_78 = arith.constant 2 : i32
    %191 = arith.muli %c2_i32_78, %c4_i32 : i32
    %c7_i32_79 = arith.constant 7 : i32
    %192 = arith.subi %c7_i32_79, %191 : i32
    %193 = arith.muli %arg0, %192 : i32
    %194 = arith.addi %c4_i32, %193 : i32
    %c0_80 = arith.constant 0 : index
    %195 = arith.index_cast %194 : i32 to index
    %c0_81 = arith.constant 0 : index
    %c0_82 = arith.constant 0 : index
    %196 = vector.load %arg3[%c0_80, %195, %c0_81, %c0_82] : memref<1x8x8x512xbf16, #tpu.memory_space<vmem>>, vector<1x1x8x512xbf16>
    %197 = vector.shape_cast %196 : vector<1x1x8x512xbf16> to vector<8x512xbf16>
    %198 = arith.extf %197 : vector<8x512xbf16> to vector<8x512xf32>
    %199 = arith.truncf %186 : vector<8x128xf32> to vector<8x128xbf16>
    %cst_83 = arith.constant dense<0.000000e+00> : vector<8x512xf32>
    %200 = tpu.matmul %199, %4, %cst_83 {dimension_numbers = #tpu.dot_dimension_numbers<[1], [0], [0], [1], [0, 0, 1, 1], [], []>} : vector<8x128xbf16>, vector<128x512xbf16>, vector<8x512xf32> -> vector<8x512xf32>
    %201 = arith.addf %198, %200 : vector<8x512xf32>
    %202 = vector.extract_strided_slice %201 {offsets = [0, 0], sizes = [8, 128], strides = [1, 1]} : vector<8x512xf32> to vector<8x128xf32>
    %cst_84 = arith.constant 5.000000e-01 : f32
    %203 = vector.broadcast %cst_84 : f32 to vector<8x128xf32>
    %204 = arith.mulf %203, %202 : vector<8x128xf32>
    %205 = math.tanh %204 : vector<8x128xf32>
    %cst_85 = arith.constant 5.000000e-01 : f32
    %206 = vector.broadcast %cst_85 : f32 to vector<8x128xf32>
    %207 = arith.mulf %206, %205 : vector<8x128xf32>
    %cst_86 = arith.constant 5.000000e-01 : f32
    %208 = vector.broadcast %cst_86 : f32 to vector<8x128xf32>
    %209 = arith.addf %207, %208 : vector<8x128xf32>
    %210 = vector.extract_strided_slice %201 {offsets = [0, 128], sizes = [8, 128], strides = [1, 1]} : vector<8x512xf32> to vector<8x128xf32>
    %cst_87 = arith.constant 5.000000e-01 : f32
    %211 = vector.broadcast %cst_87 : f32 to vector<8x128xf32>
    %212 = arith.mulf %211, %210 : vector<8x128xf32>
    %213 = math.tanh %212 : vector<8x128xf32>
    %cst_88 = arith.constant 5.000000e-01 : f32
    %214 = vector.broadcast %cst_88 : f32 to vector<8x128xf32>
    %215 = arith.mulf %214, %213 : vector<8x128xf32>
    %cst_89 = arith.constant 5.000000e-01 : f32
    %216 = vector.broadcast %cst_89 : f32 to vector<8x128xf32>
    %217 = arith.addf %215, %216 : vector<8x128xf32>
    %218 = vector.extract_strided_slice %201 {offsets = [0, 256], sizes = [8, 128], strides = [1, 1]} : vector<8x512xf32> to vector<8x128xf32>
    %219 = math.tanh %218 : vector<8x128xf32>
    %220 = vector.extract_strided_slice %201 {offsets = [0, 384], sizes = [8, 128], strides = [1, 1]} : vector<8x512xf32> to vector<8x128xf32>
    %cst_90 = arith.constant 5.000000e-01 : f32
    %221 = vector.broadcast %cst_90 : f32 to vector<8x128xf32>
    %222 = arith.mulf %221, %220 : vector<8x128xf32>
    %223 = math.tanh %222 : vector<8x128xf32>
    %cst_91 = arith.constant 5.000000e-01 : f32
    %224 = vector.broadcast %cst_91 : f32 to vector<8x128xf32>
    %225 = arith.mulf %224, %223 : vector<8x128xf32>
    %cst_92 = arith.constant 5.000000e-01 : f32
    %226 = vector.broadcast %cst_92 : f32 to vector<8x128xf32>
    %227 = arith.addf %225, %226 : vector<8x128xf32>
    %228 = arith.mulf %217, %184 : vector<8x128xf32>
    %229 = arith.mulf %209, %219 : vector<8x128xf32>
    %230 = arith.addf %228, %229 : vector<8x128xf32>
    %231 = math.tanh %230 : vector<8x128xf32>
    %232 = arith.mulf %227, %231 : vector<8x128xf32>
    %c0_93 = arith.constant 0 : index
    %233 = arith.index_cast %194 : i32 to index
    %c0_94 = arith.constant 0 : index
    %c0_95 = arith.constant 0 : index
    %234 = vector.load %arg7[%c0_93, %233, %c0_94, %c0_95] : memref<1x8x8x128xf32, #tpu.memory_space<vmem>>, vector<1x1x8x128xf32>
    %235 = vector.shape_cast %234 : vector<1x1x8x128xf32> to vector<8x128xf32>
    %236 = vector.shape_cast %232 : vector<8x128xf32> to vector<1x1x8x128xf32>
    tpu.vector_store %arg7[%c0_93, %233, %c0_94, %c0_95], %236 {strides = array<i32>} : memref<1x8x8x128xf32, #tpu.memory_space<vmem>>, vector<1x1x8x128xf32>,
    %c5_i32 = arith.constant 5 : i32
    %c2_i32_96 = arith.constant 2 : i32
    %237 = arith.muli %c2_i32_96, %c5_i32 : i32
    %c7_i32_97 = arith.constant 7 : i32
    %238 = arith.subi %c7_i32_97, %237 : i32
    %239 = arith.muli %arg0, %238 : i32
    %240 = arith.addi %c5_i32, %239 : i32
    %c0_98 = arith.constant 0 : index
    %241 = arith.index_cast %240 : i32 to index
    %c0_99 = arith.constant 0 : index
    %c0_100 = arith.constant 0 : index
    %242 = vector.load %arg3[%c0_98, %241, %c0_99, %c0_100] : memref<1x8x8x512xbf16, #tpu.memory_space<vmem>>, vector<1x1x8x512xbf16>
    %243 = vector.shape_cast %242 : vector<1x1x8x512xbf16> to vector<8x512xbf16>
    %244 = arith.extf %243 : vector<8x512xbf16> to vector<8x512xf32>
    %245 = arith.truncf %232 : vector<8x128xf32> to vector<8x128xbf16>
    %cst_101 = arith.constant dense<0.000000e+00> : vector<8x512xf32>
    %246 = tpu.matmul %245, %4, %cst_101 {dimension_numbers = #tpu.dot_dimension_numbers<[1], [0], [0], [1], [0, 0, 1, 1], [], []>} : vector<8x128xbf16>, vector<128x512xbf16>, vector<8x512xf32> -> vector<8x512xf32>
    %247 = arith.addf %244, %246 : vector<8x512xf32>
    %248 = vector.extract_strided_slice %247 {offsets = [0, 0], sizes = [8, 128], strides = [1, 1]} : vector<8x512xf32> to vector<8x128xf32>
    %cst_102 = arith.constant 5.000000e-01 : f32
    %249 = vector.broadcast %cst_102 : f32 to vector<8x128xf32>
    %250 = arith.mulf %249, %248 : vector<8x128xf32>
    %251 = math.tanh %250 : vector<8x128xf32>
    %cst_103 = arith.constant 5.000000e-01 : f32
    %252 = vector.broadcast %cst_103 : f32 to vector<8x128xf32>
    %253 = arith.mulf %252, %251 : vector<8x128xf32>
    %cst_104 = arith.constant 5.000000e-01 : f32
    %254 = vector.broadcast %cst_104 : f32 to vector<8x128xf32>
    %255 = arith.addf %253, %254 : vector<8x128xf32>
    %256 = vector.extract_strided_slice %247 {offsets = [0, 128], sizes = [8, 128], strides = [1, 1]} : vector<8x512xf32> to vector<8x128xf32>
    %cst_105 = arith.constant 5.000000e-01 : f32
    %257 = vector.broadcast %cst_105 : f32 to vector<8x128xf32>
    %258 = arith.mulf %257, %256 : vector<8x128xf32>
    %259 = math.tanh %258 : vector<8x128xf32>
    %cst_106 = arith.constant 5.000000e-01 : f32
    %260 = vector.broadcast %cst_106 : f32 to vector<8x128xf32>
    %261 = arith.mulf %260, %259 : vector<8x128xf32>
    %cst_107 = arith.constant 5.000000e-01 : f32
    %262 = vector.broadcast %cst_107 : f32 to vector<8x128xf32>
    %263 = arith.addf %261, %262 : vector<8x128xf32>
    %264 = vector.extract_strided_slice %247 {offsets = [0, 256], sizes = [8, 128], strides = [1, 1]} : vector<8x512xf32> to vector<8x128xf32>
    %265 = math.tanh %264 : vector<8x128xf32>
    %266 = vector.extract_strided_slice %247 {offsets = [0, 384], sizes = [8, 128], strides = [1, 1]} : vector<8x512xf32> to vector<8x128xf32>
    %cst_108 = arith.constant 5.000000e-01 : f32
    %267 = vector.broadcast %cst_108 : f32 to vector<8x128xf32>
    %268 = arith.mulf %267, %266 : vector<8x128xf32>
    %269 = math.tanh %268 : vector<8x128xf32>
    %cst_109 = arith.constant 5.000000e-01 : f32
    %270 = vector.broadcast %cst_109 : f32 to vector<8x128xf32>
    %271 = arith.mulf %270, %269 : vector<8x128xf32>
    %cst_110 = arith.constant 5.000000e-01 : f32
    %272 = vector.broadcast %cst_110 : f32 to vector<8x128xf32>
    %273 = arith.addf %271, %272 : vector<8x128xf32>
    %274 = arith.mulf %263, %230 : vector<8x128xf32>
    %275 = arith.mulf %255, %265 : vector<8x128xf32>
    %276 = arith.addf %274, %275 : vector<8x128xf32>
    %277 = math.tanh %276 : vector<8x128xf32>
    %278 = arith.mulf %273, %277 : vector<8x128xf32>
    %c0_111 = arith.constant 0 : index
    %279 = arith.index_cast %240 : i32 to index
    %c0_112 = arith.constant 0 : index
    %c0_113 = arith.constant 0 : index
    %280 = vector.load %arg7[%c0_111, %279, %c0_112, %c0_113] : memref<1x8x8x128xf32, #tpu.memory_space<vmem>>, vector<1x1x8x128xf32>
    %281 = vector.shape_cast %280 : vector<1x1x8x128xf32> to vector<8x128xf32>
    %282 = vector.shape_cast %278 : vector<8x128xf32> to vector<1x1x8x128xf32>
    tpu.vector_store %arg7[%c0_111, %279, %c0_112, %c0_113], %282 {strides = array<i32>} : memref<1x8x8x128xf32, #tpu.memory_space<vmem>>, vector<1x1x8x128xf32>,
    %c6_i32 = arith.constant 6 : i32
    %c2_i32_114 = arith.constant 2 : i32
    %283 = arith.muli %c2_i32_114, %c6_i32 : i32
    %c7_i32_115 = arith.constant 7 : i32
    %284 = arith.subi %c7_i32_115, %283 : i32
    %285 = arith.muli %arg0, %284 : i32
    %286 = arith.addi %c6_i32, %285 : i32
    %c0_116 = arith.constant 0 : index
    %287 = arith.index_cast %286 : i32 to index
    %c0_117 = arith.constant 0 : index
    %c0_118 = arith.constant 0 : index
    %288 = vector.load %arg3[%c0_116, %287, %c0_117, %c0_118] : memref<1x8x8x512xbf16, #tpu.memory_space<vmem>>, vector<1x1x8x512xbf16>
    %289 = vector.shape_cast %288 : vector<1x1x8x512xbf16> to vector<8x512xbf16>
    %290 = arith.extf %289 : vector<8x512xbf16> to vector<8x512xf32>
    %291 = arith.truncf %278 : vector<8x128xf32> to vector<8x128xbf16>
    %cst_119 = arith.constant dense<0.000000e+00> : vector<8x512xf32>
    %292 = tpu.matmul %291, %4, %cst_119 {dimension_numbers = #tpu.dot_dimension_numbers<[1], [0], [0], [1], [0, 0, 1, 1], [], []>} : vector<8x128xbf16>, vector<128x512xbf16>, vector<8x512xf32> -> vector<8x512xf32>
    %293 = arith.addf %290, %292 : vector<8x512xf32>
    %294 = vector.extract_strided_slice %293 {offsets = [0, 0], sizes = [8, 128], strides = [1, 1]} : vector<8x512xf32> to vector<8x128xf32>
    %cst_120 = arith.constant 5.000000e-01 : f32
    %295 = vector.broadcast %cst_120 : f32 to vector<8x128xf32>
    %296 = arith.mulf %295, %294 : vector<8x128xf32>
    %297 = math.tanh %296 : vector<8x128xf32>
    %cst_121 = arith.constant 5.000000e-01 : f32
    %298 = vector.broadcast %cst_121 : f32 to vector<8x128xf32>
    %299 = arith.mulf %298, %297 : vector<8x128xf32>
    %cst_122 = arith.constant 5.000000e-01 : f32
    %300 = vector.broadcast %cst_122 : f32 to vector<8x128xf32>
    %301 = arith.addf %299, %300 : vector<8x128xf32>
    %302 = vector.extract_strided_slice %293 {offsets = [0, 128], sizes = [8, 128], strides = [1, 1]} : vector<8x512xf32> to vector<8x128xf32>
    %cst_123 = arith.constant 5.000000e-01 : f32
    %303 = vector.broadcast %cst_123 : f32 to vector<8x128xf32>
    %304 = arith.mulf %303, %302 : vector<8x128xf32>
    %305 = math.tanh %304 : vector<8x128xf32>
    %cst_124 = arith.constant 5.000000e-01 : f32
    %306 = vector.broadcast %cst_124 : f32 to vector<8x128xf32>
    %307 = arith.mulf %306, %305 : vector<8x128xf32>
    %cst_125 = arith.constant 5.000000e-01 : f32
    %308 = vector.broadcast %cst_125 : f32 to vector<8x128xf32>
    %309 = arith.addf %307, %308 : vector<8x128xf32>
    %310 = vector.extract_strided_slice %293 {offsets = [0, 256], sizes = [8, 128], strides = [1, 1]} : vector<8x512xf32> to vector<8x128xf32>
    %311 = math.tanh %310 : vector<8x128xf32>
    %312 = vector.extract_strided_slice %293 {offsets = [0, 384], sizes = [8, 128], strides = [1, 1]} : vector<8x512xf32> to vector<8x128xf32>
    %cst_126 = arith.constant 5.000000e-01 : f32
    %313 = vector.broadcast %cst_126 : f32 to vector<8x128xf32>
    %314 = arith.mulf %313, %312 : vector<8x128xf32>
    %315 = math.tanh %314 : vector<8x128xf32>
    %cst_127 = arith.constant 5.000000e-01 : f32
    %316 = vector.broadcast %cst_127 : f32 to vector<8x128xf32>
    %317 = arith.mulf %316, %315 : vector<8x128xf32>
    %cst_128 = arith.constant 5.000000e-01 : f32
    %318 = vector.broadcast %cst_128 : f32 to vector<8x128xf32>
    %319 = arith.addf %317, %318 : vector<8x128xf32>
    %320 = arith.mulf %309, %276 : vector<8x128xf32>
    %321 = arith.mulf %301, %311 : vector<8x128xf32>
    %322 = arith.addf %320, %321 : vector<8x128xf32>
    %323 = math.tanh %322 : vector<8x128xf32>
    %324 = arith.mulf %319, %323 : vector<8x128xf32>
    %c0_129 = arith.constant 0 : index
    %325 = arith.index_cast %286 : i32 to index
    %c0_130 = arith.constant 0 : index
    %c0_131 = arith.constant 0 : index
    %326 = vector.load %arg7[%c0_129, %325, %c0_130, %c0_131] : memref<1x8x8x128xf32, #tpu.memory_space<vmem>>, vector<1x1x8x128xf32>
    %327 = vector.shape_cast %326 : vector<1x1x8x128xf32> to vector<8x128xf32>
    %328 = vector.shape_cast %324 : vector<8x128xf32> to vector<1x1x8x128xf32>
    tpu.vector_store %arg7[%c0_129, %325, %c0_130, %c0_131], %328 {strides = array<i32>} : memref<1x8x8x128xf32, #tpu.memory_space<vmem>>, vector<1x1x8x128xf32>,
    %c7_i32_132 = arith.constant 7 : i32
    %c2_i32_133 = arith.constant 2 : i32
    %329 = arith.muli %c2_i32_133, %c7_i32_132 : i32
    %c7_i32_134 = arith.constant 7 : i32
    %330 = arith.subi %c7_i32_134, %329 : i32
    %331 = arith.muli %arg0, %330 : i32
    %332 = arith.addi %c7_i32_132, %331 : i32
    %c0_135 = arith.constant 0 : index
    %333 = arith.index_cast %332 : i32 to index
    %c0_136 = arith.constant 0 : index
    %c0_137 = arith.constant 0 : index
    %334 = vector.load %arg3[%c0_135, %333, %c0_136, %c0_137] : memref<1x8x8x512xbf16, #tpu.memory_space<vmem>>, vector<1x1x8x512xbf16>
    %335 = vector.shape_cast %334 : vector<1x1x8x512xbf16> to vector<8x512xbf16>
    %336 = arith.extf %335 : vector<8x512xbf16> to vector<8x512xf32>
    %337 = arith.truncf %324 : vector<8x128xf32> to vector<8x128xbf16>
    %cst_138 = arith.constant dense<0.000000e+00> : vector<8x512xf32>
    %338 = tpu.matmul %337, %4, %cst_138 {dimension_numbers = #tpu.dot_dimension_numbers<[1], [0], [0], [1], [0, 0, 1, 1], [], []>} : vector<8x128xbf16>, vector<128x512xbf16>, vector<8x512xf32> -> vector<8x512xf32>
    %339 = arith.addf %336, %338 : vector<8x512xf32>
    %340 = vector.extract_strided_slice %339 {offsets = [0, 0], sizes = [8, 128], strides = [1, 1]} : vector<8x512xf32> to vector<8x128xf32>
    %cst_139 = arith.constant 5.000000e-01 : f32
    %341 = vector.broadcast %cst_139 : f32 to vector<8x128xf32>
    %342 = arith.mulf %341, %340 : vector<8x128xf32>
    %343 = math.tanh %342 : vector<8x128xf32>
    %cst_140 = arith.constant 5.000000e-01 : f32
    %344 = vector.broadcast %cst_140 : f32 to vector<8x128xf32>
    %345 = arith.mulf %344, %343 : vector<8x128xf32>
    %cst_141 = arith.constant 5.000000e-01 : f32
    %346 = vector.broadcast %cst_141 : f32 to vector<8x128xf32>
    %347 = arith.addf %345, %346 : vector<8x128xf32>
    %348 = vector.extract_strided_slice %339 {offsets = [0, 128], sizes = [8, 128], strides = [1, 1]} : vector<8x512xf32> to vector<8x128xf32>
    %cst_142 = arith.constant 5.000000e-01 : f32
    %349 = vector.broadcast %cst_142 : f32 to vector<8x128xf32>
    %350 = arith.mulf %349, %348 : vector<8x128xf32>
    %351 = math.tanh %350 : vector<8x128xf32>
    %cst_143 = arith.constant 5.000000e-01 : f32
    %352 = vector.broadcast %cst_143 : f32 to vector<8x128xf32>
    %353 = arith.mulf %352, %351 : vector<8x128xf32>
    %cst_144 = arith.constant 5.000000e-01 : f32
    %354 = vector.broadcast %cst_144 : f32 to vector<8x128xf32>
    %355 = arith.addf %353, %354 : vector<8x128xf32>
    %356 = vector.extract_strided_slice %339 {offsets = [0, 256], sizes = [8, 128], strides = [1, 1]} : vector<8x512xf32> to vector<8x128xf32>
    %357 = math.tanh %356 : vector<8x128xf32>
    %358 = vector.extract_strided_slice %339 {offsets = [0, 384], sizes = [8, 128], strides = [1, 1]} : vector<8x512xf32> to vector<8x128xf32>
    %cst_145 = arith.constant 5.000000e-01 : f32
    %359 = vector.broadcast %cst_145 : f32 to vector<8x128xf32>
    %360 = arith.mulf %359, %358 : vector<8x128xf32>
    %361 = math.tanh %360 : vector<8x128xf32>
    %cst_146 = arith.constant 5.000000e-01 : f32
    %362 = vector.broadcast %cst_146 : f32 to vector<8x128xf32>
    %363 = arith.mulf %362, %361 : vector<8x128xf32>
    %cst_147 = arith.constant 5.000000e-01 : f32
    %364 = vector.broadcast %cst_147 : f32 to vector<8x128xf32>
    %365 = arith.addf %363, %364 : vector<8x128xf32>
    %366 = arith.mulf %355, %322 : vector<8x128xf32>
    %367 = arith.mulf %347, %357 : vector<8x128xf32>
    %368 = arith.addf %366, %367 : vector<8x128xf32>
    %369 = math.tanh %368 : vector<8x128xf32>
    %370 = arith.mulf %365, %369 : vector<8x128xf32>
    %c0_148 = arith.constant 0 : index
    %371 = arith.index_cast %332 : i32 to index
    %c0_149 = arith.constant 0 : index
    %c0_150 = arith.constant 0 : index
    %372 = vector.load %arg7[%c0_148, %371, %c0_149, %c0_150] : memref<1x8x8x128xf32, #tpu.memory_space<vmem>>, vector<1x1x8x128xf32>
    %373 = vector.shape_cast %372 : vector<1x1x8x128xf32> to vector<8x128xf32>
    %374 = vector.shape_cast %370 : vector<8x128xf32> to vector<1x1x8x128xf32>
    tpu.vector_store %arg7[%c0_148, %371, %c0_149, %c0_150], %374 {strides = array<i32>} : memref<1x8x8x128xf32, #tpu.memory_space<vmem>>, vector<1x1x8x128xf32>,
    %c8_i32 = arith.constant 8 : i32
    %c0_151 = arith.constant 0 : index
    %c0_152 = arith.constant 0 : index
    %375 = vector.load %arg10[%c0_151, %c0_152] : memref<8x128xf32, #tpu.memory_space<vmem>>, vector<8x128xf32>
    tpu.vector_store %arg10[%c0_151, %c0_152], %370 {strides = array<i32>} : memref<8x128xf32, #tpu.memory_space<vmem>>, vector<8x128xf32>,
    %c0_153 = arith.constant 0 : index
    %c0_154 = arith.constant 0 : index
    %376 = vector.load %arg11[%c0_153, %c0_154] : memref<8x128xf32, #tpu.memory_space<vmem>>, vector<8x128xf32>
    tpu.vector_store %arg11[%c0_153, %c0_154], %368 {strides = array<i32>} : memref<8x128xf32, #tpu.memory_space<vmem>>, vector<8x128xf32>,
    %c0_i32_155 = arith.constant 0 : i32
    %377 = arith.cmpi eq, %arg2, %c0_i32_155 : i32
    %378 = arith.extui %377 : i1 to i32
    %c0_i32_156 = arith.constant 0 : i32
    %379 = arith.cmpi ne, %378, %c0_i32_156 : i32
    scf.if %379 {
      %c0_157 = arith.constant 0 : index
      %c0_158 = arith.constant 0 : index
      %c0_159 = arith.constant 0 : index
      %380 = vector.load %arg8[%c0_157, %c0_158, %c0_159] : memref<1x8x128xf32, #tpu.memory_space<vmem>>, vector<1x8x128xf32>
      %381 = vector.shape_cast %380 : vector<1x8x128xf32> to vector<8x128xf32>
      %382 = vector.shape_cast %370 : vector<8x128xf32> to vector<1x8x128xf32>
      tpu.vector_store %arg8[%c0_157, %c0_158, %c0_159], %382 {strides = array<i32>} : memref<1x8x128xf32, #tpu.memory_space<vmem>>, vector<1x8x128xf32>,
      %c0_160 = arith.constant 0 : index
      %c0_161 = arith.constant 0 : index
      %c0_162 = arith.constant 0 : index
      %383 = vector.load %arg9[%c0_160, %c0_161, %c0_162] : memref<1x8x128xf32, #tpu.memory_space<vmem>>, vector<1x8x128xf32>
      %384 = vector.shape_cast %383 : vector<1x8x128xf32> to vector<8x128xf32>
      %385 = vector.shape_cast %368 : vector<8x128xf32> to vector<1x8x128xf32>
      tpu.vector_store %arg9[%c0_160, %c0_161, %c0_162], %385 {strides = array<i32>} : memref<1x8x128xf32, #tpu.memory_space<vmem>>, vector<1x8x128xf32>,
    } else {
    }
    return
  }
  func.func @transform_0(%arg0: i32, %arg1: i32, %arg2: i32) -> (i32, i32, i32, i32) {
    %c2_i32 = arith.constant 2 : i32
    %0 = arith.muli %c2_i32, %arg2 : i32
    %c0_i32 = arith.constant 0 : i32
    %1 = arith.subi %c0_i32, %0 : i32
    %2 = arith.muli %arg0, %1 : i32
    %3 = arith.addi %arg2, %2 : i32
    %c0_i32_0 = arith.constant 0 : i32
    %c0_i32_1 = arith.constant 0 : i32
    return %arg0, %3, %arg1, %c0_i32_0 : i32, i32, i32, i32
  }
  func.func @transform_1(%arg0: i32, %arg1: i32, %arg2: i32) -> (i32, i32, i32) {
    %c0_i32 = arith.constant 0 : i32
    %c0_i32_0 = arith.constant 0 : i32
    %c0_i32_1 = arith.constant 0 : i32
    return %arg0, %c0_i32, %c0_i32_0 : i32, i32, i32
  }
  func.func @transform_2(%arg0: i32, %arg1: i32, %arg2: i32) -> (i32, i32, i32) {
    %c0_i32 = arith.constant 0 : i32
    %c0_i32_0 = arith.constant 0 : i32
    return %arg0, %arg1, %c0_i32 : i32, i32, i32
  }
  func.func @transform_3(%arg0: i32, %arg1: i32, %arg2: i32) -> (i32, i32, i32) {
    %c0_i32 = arith.constant 0 : i32
    %c0_i32_0 = arith.constant 0 : i32
    return %arg0, %arg1, %c0_i32 : i32, i32, i32
  }
  func.func @transform_4(%arg0: i32, %arg1: i32, %arg2: i32) -> (i32, i32, i32, i32) {
    %c2_i32 = arith.constant 2 : i32
    %0 = arith.muli %c2_i32, %arg2 : i32
    %c0_i32 = arith.constant 0 : i32
    %1 = arith.subi %c0_i32, %0 : i32
    %2 = arith.muli %arg0, %1 : i32
    %3 = arith.addi %arg2, %2 : i32
    %c0_i32_0 = arith.constant 0 : i32
    %c0_i32_1 = arith.constant 0 : i32
    return %arg0, %3, %arg1, %c0_i32_0 : i32, i32, i32, i32
  }
  func.func @transform_5(%arg0: i32, %arg1: i32, %arg2: i32) -> (i32, i32, i32) {
    %c0_i32 = arith.constant 0 : i32
    %c0_i32_0 = arith.constant 0 : i32
    return %arg0, %arg1, %c0_i32 : i32, i32, i32
  }
  func.func @transform_6(%arg0: i32, %arg1: i32, %arg2: i32) -> (i32, i32, i32) {
    %c0_i32 = arith.constant 0 : i32
    %c0_i32_0 = arith.constant 0 : i32
    return %arg0, %arg1, %c0_i32 : i32, i32, i32
  }
}

</mosaic_0001>

<bundles_post_ra>
// kernel: tpu_custom_call.1
= control target key start
LH: loop header
LB: loop body
LE: loop exit
PB: predicated region body
PF: predicated region fallthrough
CT: control target
= control target key end

     0   :  { %12 = vsyncpa [#allocation5], 0  ;;  %s2075_s0 = inlined_call_operand.hbm [shape: bf16[1,8,8,512], index: 0, kind: input, shape index: {}]   ;;  %s2076_s1 = inlined_call_operand.hbm [shape: bf16[1,128,512], index: 1, kind: input, shape index: {}]   ;;  %s2077_s2 = inlined_call_operand.hbm [shape: f32[1,8,128], index: 2, kind: input, shape index: {}]   ;;  %s2078_s3 = inlined_call_operand.hbm [shape: f32[1,8,128], index: 3, kind: input, shape index: {}]   ;;  %s2079_s4 = inlined_call_operand.hbm [shape: f32[1,8,8,128], index: 4, kind: output, shape index: {0}]   ;;  %s2080_s5 = inlined_call_operand.hbm [shape: f32[1,8,128], index: 5, kind: output, shape index: {1}]   ;;  %s2081_s6 = inlined_call_operand.hbm [shape: f32[1,8,128], index: 6, kind: output, shape index: {2}]  }
   0x1   :  { %13 = vsyncpa [#allocation8], 0 }
   0x2   :  { %14 = vsyncpa [#allocation11], 0 }
   0x3   :  { %15 = vsyncpa [#allocation6], 0 }
   0x4   :  { %16 = vsyncpa [#allocation14], 0  ;;  %s1679_s21 = smov [#allocation7]   ;;  %s1680_s23 = smov [#allocation4]  }
   0x5   :  { %s42_s22 = sshll.u32 %s1679_s21, 4  ;;  %s30_s24 = sshll.u32 %s1680_s23, 4  ;;  %s43_s22 = int_to_ptr.vmem [resolvable:$true] %s42_s22  ;;  %s31_s24 = int_to_ptr.vmem [resolvable:$true] %s30_s24 }
   0x6   :  { %s1537_s25 = scalar_lea.vmem %s43_s22, 4096  ;;  %p1542_p1 = scmp.lt.s32.totalorder %s43_s22, %s43_s22 }
   0x7   :  { %p1538_p0 = scmp.ne.s32.totalorder %s43_s22, %s1537_s25  ;;  %p1543_p2 = scmp.lt.s32.totalorder %s1537_s25, %s1537_s25 }
   0x9   :  { %p1544_p3 = por %p1543_p2, %p1542_p1 }
   0xb   :  { %p1545_p4 = pnand %p1544_p3, %p1538_p0 }
   0xd   :  { %1548 = shalt.err (!%p1545_p4)
}
   0xe   :  { %s1681_s26 = smov 256   ;;  %s1682_s27 = smov 16  }
   0xf   :  { %48 = dma.hbm_to_vmem [thread:$0]  %s2076_s1, 4096, %s43_s22, [#allocation8], %s1681_s26, %s1681_s26, %s1682_s27  }
  0x10   :  { %s1557_s30 = scalar_lea.vmem %s31_s24, 2048  ;;  %p1562_p6 = scmp.lt.s32.totalorder %s31_s24, %s31_s24 }
  0x11   :  { %p1558_p5 = scmp.ne.s32.totalorder %s31_s24, %s1557_s30  ;;  %p1563_p7 = scmp.lt.s32.totalorder %s1557_s30, %s1557_s30 }
  0x13   :  { %p1564_p8 = por %p1563_p7, %p1562_p6 }
  0x15   :  { %p1565_p9 = pnand %p1564_p8, %p1558_p5 }
  0x17   :  { %1568 = shalt.err (!%p1565_p9)
}
  0x18   :  { %36 = dma.hbm_to_vmem [thread:$0]  %s2075_s0, 2048, %s31_s24, [#allocation5], %s1681_s26, %s1681_s26, %s1682_s27  }
  0x19   :  { %s1683_s9 = smov [#allocation9]   ;;  %s1684_s11 = smov [#allocation10]  }
  0x1a   :  { %s55_s10 = sshll.u32 %s1683_s9, 4  ;;  %s65_s12 = sshll.u32 %s1684_s11, 4  ;;  %s56_s10 = int_to_ptr.vmem [resolvable:$true] %s55_s10  ;;  %s66_s12 = int_to_ptr.vmem [resolvable:$true] %s65_s12 }
  0x1b   :  { %s1577_s13 = scalar_lea.vmem %s56_s10, 128  ;;  %p1582_p11 = scmp.lt.s32.totalorder %s56_s10, %s56_s10 }
  0x1c   :  { %p1578_p10 = scmp.ne.s32.totalorder %s56_s10, %s1577_s13  ;;  %p1583_p12 = scmp.lt.s32.totalorder %s1577_s13, %s1577_s13 }
  0x1e   :  { %p1584_p13 = por %p1583_p12, %p1582_p11 }
  0x20   :  { %p1585_p0 = pnand %p1584_p13, %p1578_p10 }
  0x22   :  { %1588 = shalt.err (!%p1585_p0)
}
  0x23   :  { %58 = dma.hbm_to_vmem [thread:$0]  %s2077_s2, 128, %s56_s10, [#allocation8]  }
  0x24   :  { %s1597_s15 = scalar_lea.vmem %s66_s12, 128  ;;  %p1602_p2 = scmp.lt.s32.totalorder %s66_s12, %s66_s12 }
  0x25   :  { %p1598_p1 = scmp.ne.s32.totalorder %s66_s12, %s1597_s15  ;;  %p1603_p3 = scmp.lt.s32.totalorder %s1597_s15, %s1597_s15 }
  0x27   :  { %p1604_p4 = por %p1603_p3, %p1602_p2 }
  0x29   :  { %p1605_p5 = pnand %p1604_p4, %p1598_p1 }
  0x2b   :  { %1608 = shalt.err (!%p1605_p5)
}
  0x2c   :  { %68 = dma.hbm_to_vmem [thread:$0]  %s2078_s3, 128, %s66_s12, [#allocation11]  }
  0x2d   :  { %1669 = dma.done.wait [#allocation5], 2048  }
  0x2e   :  { %1670 = vsyncadd [#allocation5], 4294965248 }
  0x2f   :  { %1671 = dma.done.wait [#allocation8], 4224  }
  0x30   :  { %1672 = vsyncadd [#allocation8], 4294963072 }
  0x31   :  { %1673 = dma.done.wait [#allocation11], 128  }
  0x32   :  { %1674 = vsyncadd [#allocation11], 4294967168  ;;  %v1685_v0 = vmov 0   ;;  %v1740_v1 = vld [vmem:[#allocation7 + $0xe4] ss:$16 sps:$4 sm:$0xff]   ;;  %v139_v37 = vld [vmem:[#allocation4 + $0x8] sm:$0xff] }
  0x33   :  { %337 = vmatprep.mubr.bf16.mxu0 %v1685_v0  ;;  %378 = vmatprep.mubr.bf16.mxu1 %v1685_v0  ;;  %v1742_v2 = vld [vmem:[#allocation7 + $0xe0] ss:$16 sps:$4 sm:$0xff]   ;;  %v1745_v3 = vld [vmem:[#allocation7 + $0xec] ss:$16 sps:$4 sm:$0xff]   ;;  %v1747_v4 = vld [vmem:[#allocation7 + $0xe8] ss:$16 sps:$4 sm:$0xff]   ;;  %v142_v41 = vunpack.c.l.bf16 %v139_v37  ;;  %v143_v53 = vunpack.c.h.bf16 %v139_v37 }
  0x34   :  { %305 = vmatprep.subr.bf16.mxu0 %v1740_v1  ;;  %v1750_v5 = vld [vmem:[#allocation7 + $0xc4] ss:$16 sps:$4 sm:$0xff]   ;;  %v1752_v6 = vld [vmem:[#allocation7 + $0xc0] ss:$16 sps:$4 sm:$0xff]   ;;  %346 = vmatprep.subr.bf16.mxu1 %v1745_v3  ;;  %v1755_v7 = vld [vmem:[#allocation7 + $0xcc] ss:$16 sps:$4 sm:$0xff]  }
  0x35   :  { %306 = vmatpush1.bf16.msra.mxu0 %v1742_v2  ;;  %347 = vmatpush1.bf16.msra.mxu1 %v1747_v4  ;;  %v1759_v8 = vld [vmem:[#allocation7 + $0xc8] ss:$16 sps:$4 sm:$0xff]   ;;  %v1762_v9 = vld [vmem:[#allocation7 + $0xa4] ss:$16 sps:$4 sm:$0xff]   ;;  %v1765_v10 = vld [vmem:[#allocation7 + $0xa0] ss:$16 sps:$4 sm:$0xff]  }
  0x36   :  { %307 = vmatprep.subr.bf16.mxu0 %v1750_v5  ;;  %348 = vmatprep.subr.bf16.mxu1 %v1755_v7  ;;  %v1767_v11 = vld [vmem:[#allocation7 + $0xac] ss:$16 sps:$4 sm:$0xff]   ;;  %v1770_v12 = vld [vmem:[#allocation7 + $0x84] ss:$16 sps:$4 sm:$0xff]   ;;  %v1773_v13 = vld [vmem:[#allocation7 + $0xa8] ss:$16 sps:$4 sm:$0xff]  }
  0x37   :  { %v1776_v14 = vld [vmem:[#allocation7 + $0x8c] ss:$16 sps:$4 sm:$0xff]   ;;  %v1779_v15 = vld [vmem:[#allocation7 + $0x80] ss:$16 sps:$4 sm:$0xff]   ;;  %v1782_v16 = vld [vmem:[#allocation7 + $0x64] ss:$16 sps:$4 sm:$0xff]  }
  0x38   :  { %v1785_v17 = vld [vmem:[#allocation7 + $0x88] ss:$16 sps:$4 sm:$0xff]   ;;  %v1788_v18 = vld [vmem:[#allocation7 + $0x6c] ss:$16 sps:$4 sm:$0xff]   ;;  %v1791_v19 = vld [vmem:[#allocation7 + $0x60] ss:$16 sps:$4 sm:$0xff]  }
  0x39   :  { %308 = vmatpush1.bf16.msra.mxu0 %v1752_v6  ;;  %349 = vmatpush1.bf16.msra.mxu1 %v1759_v8  ;;  %v1794_v20 = vld [vmem:[#allocation7 + $0x44] ss:$16 sps:$4 sm:$0xff]   ;;  %v1797_v21 = vld [vmem:[#allocation7 + $0x68] ss:$16 sps:$4 sm:$0xff]   ;;  %v1800_v22 = vld [vmem:[#allocation7 + $0x4c] ss:$16 sps:$4 sm:$0xff]  }
  0x3a   :  { %309 = vmatprep.subr.bf16.mxu0 %v1762_v9  ;;  %350 = vmatprep.subr.bf16.mxu1 %v1767_v11  ;;  %v1803_v23 = vld [vmem:[#allocation7 + $0x40] ss:$16 sps:$4 sm:$0xff]   ;;  %v1806_v24 = vld [vmem:[#allocation7 + $0x24] ss:$16 sps:$4 sm:$0xff]   ;;  %v1809_v25 = vld [vmem:[#allocation7 + $0x48] ss:$16 sps:$4 sm:$0xff]  }
  0x3b   :  { %v1812_v26 = vld [vmem:[#allocation7 + $0x2c] ss:$16 sps:$4 sm:$0xff]   ;;  %v1815_v27 = vld [vmem:[#allocation7 + $0x20] ss:$16 sps:$4 sm:$0xff]   ;;  %v1818_v28 = vld [vmem:[#allocation7 + $0x4] ss:$16 sps:$4 sm:$0xff]  }
  0x3c   :  { %v1821_v29 = vld [vmem:[#allocation7 + $0x28] ss:$16 sps:$4 sm:$0xff]   ;;  %v1824_v30 = vld [vmem:[#allocation7 + $0xc] ss:$16 sps:$4 sm:$0xff]   ;;  %v1827_v31 = vld [vmem:[#allocation7] ss:$16 sps:$4 sm:$0xff]  }
  0x3d   :  { %310 = vmatpush1.bf16.msra.mxu0 %v1765_v10  ;;  %351 = vmatpush1.bf16.msra.mxu1 %v1773_v13  ;;  %v96_v32 = vld [vmem:[#allocation9] sm:$0xff]  ;;  %v1831_v33 = vld [vmem:[#allocation7 + $0x8] ss:$16 sps:$4 sm:$0xff]   ;;  %s1686_s2 = smov [#allocation13]   ;;  %s1687_s17 = smov [#allocation12]  }
  0x3e   :  { %311 = vmatprep.subr.bf16.mxu0 %v1770_v12  ;;  %352 = vmatprep.subr.bf16.mxu1 %v1776_v14  ;;  %v144_v34 = vpack.c.bf16 %v96_v32, %v96_v32  ;;  %v138_v35 = vld [vmem:[#allocation4] sm:$0xff]  ;;  %v98_v62 = vld [vmem:[#allocation10] sm:$0xff]  ;;  %s1275_s3 = sshll.u32 %s1686_s2, 4  ;;  %s1262_s18 = sshll.u32 %s1687_s17, 4  ;;  %s1276_s3 = int_to_ptr.vmem [resolvable:$true] %s1275_s3  ;;  %s1263_s18 = int_to_ptr.vmem [resolvable:$true] %s1262_s18 }
  0x3f   :  { %v140_v36 = vunpack.c.l.bf16 %v138_v35  ;;  %v141_v38 = vunpack.c.h.bf16 %v138_v35  ;;  %s1688_s19 = smov [#allocation15]   ;;  %s1609_s21 = scalar_lea.vmem %s1276_s3, 128 }
  0x40   :  { %s1285_s20 = sshll.u32 %s1688_s19, 4  ;;  %p1610_p6 = scmp.ne.s32.totalorder %s1276_s3, %s1609_s21  ;;  %s1286_s20 = int_to_ptr.vmem [resolvable:$true] %s1285_s20 }
  0x41   :  { %312 = vmatpush1.bf16.msra.mxu0 %v1779_v15  ;;  %353 = vmatpush1.bf16.msra.mxu1 %v1785_v17  ;;  %p1614_p7 = scmp.lt.s32.totalorder %s1276_s3, %s1276_s3  ;;  %p1615_p8 = scmp.lt.s32.totalorder %s1609_s21, %s1609_s21 }
  0x42   :  { %313 = vmatprep.subr.bf16.mxu0 %v1782_v16  ;;  %354 = vmatprep.subr.bf16.mxu1 %v1788_v18 }
  0x43   :  { %p1616_p9 = por %p1615_p8, %p1614_p7 }
  0x45   :  { %314 = vmatpush1.bf16.msra.mxu0 %v1791_v19  ;;  %355 = vmatpush1.bf16.msra.mxu1 %v1797_v21  ;;  %p1617_p10 = pnand %p1616_p9, %p1610_p6 }
  0x46   :  { %315 = vmatprep.subr.bf16.mxu0 %v1794_v20  ;;  %356 = vmatprep.subr.bf16.mxu1 %v1800_v22 }
  0x49   :  { %316 = vmatpush1.bf16.msra.mxu0 %v1803_v23  ;;  %357 = vmatpush1.bf16.msra.mxu1 %v1809_v25 }
  0x4a   :  { %317 = vmatprep.subr.bf16.mxu0 %v1806_v24  ;;  %358 = vmatprep.subr.bf16.mxu1 %v1812_v26 }
  0x4d   :  { %318 = vmatpush1.bf16.msra.mxu0 %v1815_v27  ;;  %359 = vmatpush1.bf16.msra.mxu1 %v1821_v29 }
  0x4e   :  { %319 = vmatprep.subr.bf16.mxu0 %v1818_v28  ;;  %360 = vmatprep.subr.bf16.mxu1 %v1824_v30 }
  0x51   :  { %320 = vmatpush1.bf16.msra.mxu0 %v1827_v31  ;;  %361 = vmatpush1.bf16.msra.mxu1 %v1831_v33 }
  0x52   :  { %424 = vmatprep.subr.bf16.mxu0 %v1740_v1  ;;  %465 = vmatprep.subr.bf16.mxu1 %v1745_v3 }
  0x54   :  { %338 = vmatmul.mubr.bf16.vlgmr.msra.gmra.mxu0 %v144_v34  ;;  %379 = vmatmul.mubr.bf16.vlgmr.msra.gmra.mxu1 %v144_v34 }
  0x55   :  { %425 = vmatpush1.bf16.msra.mxu0 %v1742_v2  ;;  %456 = vmatprep.mubr.bf16.mxu0 %v1685_v0 }
  0x56   :  { %426 = vmatprep.subr.bf16.mxu0 %v1750_v5  ;;  %466 = vmatpush1.bf16.msra.mxu1 %v1747_v4 }
  0x57   :  { %497 = vmatprep.mubr.bf16.mxu1 %v1685_v0  ;;  %467 = vmatprep.subr.bf16.mxu1 %v1755_v7 }
  0x59   :  { %427 = vmatpush1.bf16.msra.mxu0 %v1752_v6 }
  0x5a   :  { %428 = vmatprep.subr.bf16.mxu0 %v1762_v9  ;;  %468 = vmatpush1.bf16.msra.mxu1 %v1759_v8 }
  0x5b   :  { %469 = vmatprep.subr.bf16.mxu1 %v1767_v11 }
  0x5d   :  { %429 = vmatpush1.bf16.msra.mxu0 %v1765_v10 }
  0x5e   :  { %430 = vmatprep.subr.bf16.mxu0 %v1770_v12  ;;  %470 = vmatpush1.bf16.msra.mxu1 %v1773_v13 }
  0x5f   :  { %471 = vmatprep.subr.bf16.mxu1 %v1776_v14 }
  0x61   :  { %431 = vmatpush1.bf16.msra.mxu0 %v1779_v15 }
  0x62   :  { %432 = vmatprep.subr.bf16.mxu0 %v1782_v16  ;;  %472 = vmatpush1.bf16.msra.mxu1 %v1785_v17 }
  0x63   :  { %473 = vmatprep.subr.bf16.mxu1 %v1788_v18 }
  0x65   :  { %433 = vmatpush1.bf16.msra.mxu0 %v1791_v19 }
  0x66   :  { %434 = vmatprep.subr.bf16.mxu0 %v1794_v20  ;;  %474 = vmatpush1.bf16.msra.mxu1 %v1797_v21 }
  0x67   :  { %475 = vmatprep.subr.bf16.mxu1 %v1800_v22 }
  0x69   :  { %435 = vmatpush1.bf16.msra.mxu0 %v1803_v23 }
  0x6a   :  { %436 = vmatprep.subr.bf16.mxu0 %v1806_v24  ;;  %476 = vmatpush1.bf16.msra.mxu1 %v1809_v25 }
  0x6b   :  { %477 = vmatprep.subr.bf16.mxu1 %v1812_v26 }
  0x6d   :  { %437 = vmatpush1.bf16.msra.mxu0 %v1815_v27 }
  0x6e   :  { %438 = vmatprep.subr.bf16.mxu0 %v1818_v28  ;;  %478 = vmatpush1.bf16.msra.mxu1 %v1821_v29 }
  0x6f   :  { %479 = vmatprep.subr.bf16.mxu1 %v1824_v30 }
  0x71   :  { %439 = vmatpush1.bf16.msra.mxu0 %v1827_v31 }
  0x72   :  { %543 = vmatprep.subr.bf16.mxu0 %v1740_v1  ;;  %480 = vmatpush1.bf16.msra.mxu1 %v1831_v33 }
  0x73   :  { %584 = vmatprep.subr.bf16.mxu1 %v1745_v3 }
 0x114   :  { %v339_v39 = vpop.f32.mrf.mxu0  ;;  %v380_v43 = vpop.f32.mrf.mxu1 }
 0x115   :  { %v387_v40 = vadd.f32 %v339_v39, %v140_v36  ;;  %v389_v49 = vadd.f32 %v380_v43, %v142_v41 }
 0x116   :  { %v341_v42 = vpop.f32.mrf.mxu0  ;;  %v382_v47 = vpop.f32.mrf.mxu1 }
 0x117   :  { %v391_v44 = vmul.f32 0.5, %v387_v40  ;;  %v388_v45 = vadd.f32 %v341_v42, %v141_v38  ;;  %v390_v54 = vadd.f32 %v382_v47, %v143_v53  ;;  %v417_v42 = vld [vmem:[#allocation4 + $0x10] sm:$0xff] }
 0x118   :  { %v343_v46 = vpop.f32.mrf.mxu0  ;;  %v384_v51 = vpop.f32.mrf.mxu1  ;;  %v419_v43 = vunpack.c.l.bf16 %v417_v42 }
 0x119   :  { %1417 = vtanh.f32 %v391_v44  ;;  %v395_v48 = vmul.f32 0.5, %v388_v45  ;;  %v400_v55 = vmul.f32 0.5, %v390_v54  ;;  %v420_v44 = vunpack.c.h.bf16 %v417_v42  ;;  %v418_v46 = vld [vmem:[#allocation4 + $0x18] sm:$0xff] }
 0x11a   :  { %v344_v50 = vpop.f32.mrf.mxu0  ;;  %v385_v52 = vpop.f32.mrf.mxu1 }
 0x11b   :  { %1419 = vtanh.f32 %v395_v48  ;;  %v421_v52 = vunpack.c.l.bf16 %v418_v46 }
 0x11c   :  { %1421 = vtanh.f32 %v389_v49 }
 0x11d   :  { %1423 = vtanh.f32 %v400_v55 }
 0x126   :  { %v1418_v56 = vpop.eup %1417 }
 0x127   :  { %v393_v57 = vmul.f32 0.5, %v1418_v56 }
 0x128   :  { %v1420_v58 = vpop.eup %1419 }
 0x129   :  { %v394_v59 = vadd.f32 0.5, %v393_v57  ;;  %v397_v60 = vmul.f32 0.5, %v1420_v58  ;;  %v1422_v61 = vpop.eup %1421 }
 0x12a   :  { %v1424_v36 = vpop.eup %1423 }
 0x12b   :  { %v398_v63 = vadd.f32 0.5, %v397_v60  ;;  %v405_v34 = vmul.f32 %v1422_v61, %v394_v59  ;;  %v402_v38 = vmul.f32 0.5, %v1424_v36  ;;  %v422_v60 = vunpack.c.h.bf16 %v418_v46 }
 0x12d   :  { %v404_v32 = vmul.f32 %v398_v63, %v98_v62  ;;  %v403_v37 = vadd.f32 0.5, %v402_v38 }
 0x12f   :  { %v1872_v35 = vadd.f32 %v405_v34, %v404_v32 }
 0x131   :  { %1425 = vtanh.f32 %v1872_v35 }
 0x13e   :  { %v1426_v39 = vpop.eup %1425 }
 0x13f   :  { %v408_v40 = vmul.f32 %v1426_v39, %v403_v37 }
 0x141   :  { %411 = vst [vmem:[#allocation12] sm:$0xff] %v408_v40  ;;  %v423_v41 = vpack.c.bf16 %v408_v40, %v408_v40 }
 0x143   :  { %457 = vmatmul.mubr.bf16.vlgmr.msra.gmra.mxu0 %v423_v41  ;;  %498 = vmatmul.mubr.bf16.vlgmr.msra.gmra.mxu1 %v423_v41 }
 0x144   :  { %544 = vmatpush1.bf16.msra.mxu0 %v1742_v2  ;;  %585 = vmatpush1.bf16.msra.mxu1 %v1747_v4 }
 0x145   :  { %545 = vmatprep.subr.bf16.mxu0 %v1750_v5  ;;  %586 = vmatprep.subr.bf16.mxu1 %v1755_v7 }
 0x146   :  { %575 = vmatprep.mubr.bf16.mxu0 %v1685_v0  ;;  %616 = vmatprep.mubr.bf16.mxu1 %v1685_v0 }
 0x148   :  { %546 = vmatpush1.bf16.msra.mxu0 %v1752_v6  ;;  %587 = vmatpush1.bf16.msra.mxu1 %v1759_v8 }
 0x149   :  { %547 = vmatprep.subr.bf16.mxu0 %v1762_v9  ;;  %588 = vmatprep.subr.bf16.mxu1 %v1767_v11 }
 0x14c   :  { %548 = vmatpush1.bf16.msra.mxu0 %v1765_v10  ;;  %589 = vmatpush1.bf16.msra.mxu1 %v1773_v13 }
 0x14d   :  { %549 = vmatprep.subr.bf16.mxu0 %v1770_v12  ;;  %590 = vmatprep.subr.bf16.mxu1 %v1776_v14 }
 0x150   :  { %550 = vmatpush1.bf16.msra.mxu0 %v1779_v15  ;;  %591 = vmatpush1.bf16.msra.mxu1 %v1785_v17 }
 0x151   :  { %551 = vmatprep.subr.bf16.mxu0 %v1782_v16  ;;  %592 = vmatprep.subr.bf16.mxu1 %v1788_v18 }
 0x154   :  { %552 = vmatpush1.bf16.msra.mxu0 %v1791_v19  ;;  %593 = vmatpush1.bf16.msra.mxu1 %v1797_v21 }
 0x155   :  { %553 = vmatprep.subr.bf16.mxu0 %v1794_v20  ;;  %594 = vmatprep.subr.bf16.mxu1 %v1800_v22 }
 0x158   :  { %554 = vmatpush1.bf16.msra.mxu0 %v1803_v23  ;;  %595 = vmatpush1.bf16.msra.mxu1 %v1809_v25 }
 0x159   :  { %555 = vmatprep.subr.bf16.mxu0 %v1806_v24  ;;  %596 = vmatprep.subr.bf16.mxu1 %v1812_v26 }
 0x15c   :  { %556 = vmatpush1.bf16.msra.mxu0 %v1815_v27  ;;  %597 = vmatpush1.bf16.msra.mxu1 %v1821_v29 }
 0x15d   :  { %557 = vmatprep.subr.bf16.mxu0 %v1818_v28  ;;  %598 = vmatprep.subr.bf16.mxu1 %v1824_v30 }
 0x160   :  { %558 = vmatpush1.bf16.msra.mxu0 %v1827_v31  ;;  %599 = vmatpush1.bf16.msra.mxu1 %v1831_v33 }
 0x161   :  { %661 = vmatprep.subr.bf16.mxu0 %v1740_v1  ;;  %702 = vmatprep.subr.bf16.mxu1 %v1745_v3 }
 0x203   :  { %v458_v45 = vpop.f32.mrf.mxu0  ;;  %v499_v47 = vpop.f32.mrf.mxu1 }
 0x204   :  { %v506_v48 = vadd.f32 %v458_v45, %v419_v43  ;;  %v508_v59 = vadd.f32 %v499_v47, %v421_v52  ;;  %v537_v52 = vld [vmem:[#allocation4 + $0x28] sm:$0xff] }
 0x205   :  { %v460_v49 = vpop.f32.mrf.mxu0  ;;  %v501_v50 = vpop.f32.mrf.mxu1 }
 0x206   :  { %v510_v51 = vmul.f32 0.5, %v506_v48  ;;  %v507_v53 = vadd.f32 %v460_v49, %v420_v44  ;;  %v509_v61 = vadd.f32 %v501_v50, %v422_v60 }
 0x207   :  { %v462_v54 = vpop.f32.mrf.mxu0  ;;  %v503_v55 = vpop.f32.mrf.mxu1 }
 0x208   :  { %1427 = vtanh.f32 %v510_v51  ;;  %v514_v56 = vmul.f32 0.5, %v507_v53  ;;  %v519_v62 = vmul.f32 0.5, %v509_v61 }
 0x209   :  { %v463_v57 = vpop.f32.mrf.mxu0  ;;  %v504_v58 = vpop.f32.mrf.mxu1 }
 0x20a   :  { %1429 = vtanh.f32 %v514_v56  ;;  %v540_v58 = vunpack.c.l.bf16 %v537_v52 }
 0x20b   :  { %1431 = vtanh.f32 %v508_v59 }
 0x20c   :  { %1433 = vtanh.f32 %v519_v62 }
 0x215   :  { %v1428_v63 = vpop.eup %1427 }
 0x216   :  { %v512_v32 = vmul.f32 0.5, %v1428_v63 }
 0x217   :  { %v1430_v34 = vpop.eup %1429 }
 0x218   :  { %v513_v36 = vadd.f32 0.5, %v512_v32  ;;  %v516_v38 = vmul.f32 0.5, %v1430_v34  ;;  %v1432_v39 = vpop.eup %1431 }
 0x219   :  { %v1434_v43 = vpop.eup %1433 }
 0x21a   :  { %v517_v37 = vadd.f32 0.5, %v516_v38  ;;  %v524_v41 = vmul.f32 %v1432_v39, %v513_v36  ;;  %v521_v44 = vmul.f32 0.5, %v1434_v43  ;;  %v541_v36 = vunpack.c.h.bf16 %v537_v52 }
 0x21c   :  { %v523_v40 = vmul.f32 %v517_v37, %v1872_v35  ;;  %v522_v45 = vadd.f32 0.5, %v521_v44  ;;  %v536_v35 = vld [vmem:[#allocation4 + $0x20] sm:$0xff] }
 0x21d   :  { %v538_v49 = vunpack.c.l.bf16 %v536_v35  ;;  %v539_v50 = vunpack.c.h.bf16 %v536_v35 }
 0x21e   :  { %v1910_v42 = vadd.f32 %v524_v41, %v523_v40 }
 0x220   :  { %1435 = vtanh.f32 %v1910_v42 }
 0x22d   :  { %v1436_v46 = vpop.eup %1435 }
 0x22e   :  { %v527_v47 = vmul.f32 %v1436_v46, %v522_v45 }
 0x230   :  { %530 = vst [vmem:[#allocation12 + $0x8] sm:$0xff] %v527_v47  ;;  %v542_v48 = vpack.c.bf16 %v527_v47, %v527_v47 }
 0x232   :  { %576 = vmatmul.mubr.bf16.vlgmr.msra.gmra.mxu0 %v542_v48  ;;  %617 = vmatmul.mubr.bf16.vlgmr.msra.gmra.mxu1 %v542_v48 }
 0x233   :  { %662 = vmatpush1.bf16.msra.mxu0 %v1742_v2  ;;  %703 = vmatpush1.bf16.msra.mxu1 %v1747_v4 }
 0x234   :  { %663 = vmatprep.subr.bf16.mxu0 %v1750_v5  ;;  %704 = vmatprep.subr.bf16.mxu1 %v1755_v7 }
 0x235   :  { %693 = vmatprep.mubr.bf16.mxu0 %v1685_v0  ;;  %734 = vmatprep.mubr.bf16.mxu1 %v1685_v0 }
 0x237   :  { %664 = vmatpush1.bf16.msra.mxu0 %v1752_v6  ;;  %705 = vmatpush1.bf16.msra.mxu1 %v1759_v8 }
 0x238   :  { %665 = vmatprep.subr.bf16.mxu0 %v1762_v9  ;;  %706 = vmatprep.subr.bf16.mxu1 %v1767_v11 }
 0x23b   :  { %666 = vmatpush1.bf16.msra.mxu0 %v1765_v10  ;;  %707 = vmatpush1.bf16.msra.mxu1 %v1773_v13 }
 0x23c   :  { %667 = vmatprep.subr.bf16.mxu0 %v1770_v12  ;;  %708 = vmatprep.subr.bf16.mxu1 %v1776_v14 }
 0x23f   :  { %668 = vmatpush1.bf16.msra.mxu0 %v1779_v15  ;;  %709 = vmatpush1.bf16.msra.mxu1 %v1785_v17 }
 0x240   :  { %669 = vmatprep.subr.bf16.mxu0 %v1782_v16  ;;  %710 = vmatprep.subr.bf16.mxu1 %v1788_v18 }
 0x243   :  { %670 = vmatpush1.bf16.msra.mxu0 %v1791_v19  ;;  %711 = vmatpush1.bf16.msra.mxu1 %v1797_v21 }
 0x244   :  { %671 = vmatprep.subr.bf16.mxu0 %v1794_v20  ;;  %712 = vmatprep.subr.bf16.mxu1 %v1800_v22 }
 0x247   :  { %672 = vmatpush1.bf16.msra.mxu0 %v1803_v23  ;;  %713 = vmatpush1.bf16.msra.mxu1 %v1809_v25 }
 0x248   :  { %673 = vmatprep.subr.bf16.mxu0 %v1806_v24  ;;  %714 = vmatprep.subr.bf16.mxu1 %v1812_v26 }
 0x24b   :  { %674 = vmatpush1.bf16.msra.mxu0 %v1815_v27  ;;  %715 = vmatpush1.bf16.msra.mxu1 %v1821_v29 }
 0x24c   :  { %675 = vmatprep.subr.bf16.mxu0 %v1818_v28  ;;  %716 = vmatprep.subr.bf16.mxu1 %v1824_v30 }
 0x24f   :  { %676 = vmatpush1.bf16.msra.mxu0 %v1827_v31  ;;  %717 = vmatpush1.bf16.msra.mxu1 %v1831_v33 }
 0x250   :  { %779 = vmatprep.subr.bf16.mxu0 %v1740_v1  ;;  %820 = vmatprep.subr.bf16.mxu1 %v1745_v3 }
 0x2f2   :  { %v577_v51 = vpop.f32.mrf.mxu0  ;;  %v618_v53 = vpop.f32.mrf.mxu1 }
 0x2f3   :  { %v625_v54 = vadd.f32 %v577_v51, %v538_v49  ;;  %v627_v34 = vadd.f32 %v618_v53, %v540_v58  ;;  %v655_v58 = vld [vmem:[#allocation4 + $0x38] sm:$0xff] }
 0x2f4   :  { %v579_v55 = vpop.f32.mrf.mxu0  ;;  %v620_v56 = vpop.f32.mrf.mxu1 }
 0x2f5   :  { %v629_v57 = vmul.f32 0.5, %v625_v54  ;;  %v626_v59 = vadd.f32 %v579_v55, %v539_v50  ;;  %v628_v38 = vadd.f32 %v620_v56, %v541_v36 }
 0x2f6   :  { %v581_v60 = vpop.f32.mrf.mxu0  ;;  %v622_v61 = vpop.f32.mrf.mxu1 }
 0x2f7   :  { %1437 = vtanh.f32 %v629_v57  ;;  %v633_v62 = vmul.f32 0.5, %v626_v59  ;;  %v638_v37 = vmul.f32 0.5, %v628_v38 }
 0x2f8   :  { %v582_v63 = vpop.f32.mrf.mxu0  ;;  %v623_v32 = vpop.f32.mrf.mxu1 }
 0x2f9   :  { %1439 = vtanh.f32 %v633_v62  ;;  %v658_v32 = vunpack.c.l.bf16 %v655_v58 }
 0x2fa   :  { %1441 = vtanh.f32 %v627_v34 }
 0x2fb   :  { %1443 = vtanh.f32 %v638_v37 }
 0x304   :  { %v1438_v39 = vpop.eup %1437 }
 0x305   :  { %v631_v40 = vmul.f32 0.5, %v1438_v39 }
 0x306   :  { %v1440_v41 = vpop.eup %1439 }
 0x307   :  { %v632_v43 = vadd.f32 0.5, %v631_v40  ;;  %v635_v44 = vmul.f32 0.5, %v1440_v41  ;;  %v1442_v46 = vpop.eup %1441 }
 0x308   :  { %v1444_v49 = vpop.eup %1443 }
 0x309   :  { %v636_v45 = vadd.f32 0.5, %v635_v44  ;;  %v643_v48 = vmul.f32 %v1442_v46, %v632_v43  ;;  %v640_v50 = vmul.f32 0.5, %v1444_v49  ;;  %v659_v43 = vunpack.c.h.bf16 %v655_v58 }
 0x30b   :  { %v642_v47 = vmul.f32 %v636_v45, %v1910_v42  ;;  %v641_v51 = vadd.f32 0.5, %v640_v50  ;;  %v654_v42 = vld [vmem:[#allocation4 + $0x30] sm:$0xff] }
 0x30c   :  { %v656_v55 = vunpack.c.l.bf16 %v654_v42  ;;  %v657_v56 = vunpack.c.h.bf16 %v654_v42 }
 0x30d   :  { %v1948_v35 = vadd.f32 %v643_v48, %v642_v47 }
 0x30f   :  { %1445 = vtanh.f32 %v1948_v35 }
 0x31c   :  { %v1446_v52 = vpop.eup %1445 }
 0x31d   :  { %v646_v53 = vmul.f32 %v1446_v52, %v641_v51 }
 0x31f   :  { %649 = vst [vmem:[#allocation12 + $0x10] sm:$0xff] %v646_v53  ;;  %v660_v54 = vpack.c.bf16 %v646_v53, %v646_v53 }
 0x321   :  { %694 = vmatmul.mubr.bf16.vlgmr.msra.gmra.mxu0 %v660_v54  ;;  %735 = vmatmul.mubr.bf16.vlgmr.msra.gmra.mxu1 %v660_v54 }
 0x322   :  { %780 = vmatpush1.bf16.msra.mxu0 %v1742_v2  ;;  %821 = vmatpush1.bf16.msra.mxu1 %v1747_v4 }
 0x323   :  { %781 = vmatprep.subr.bf16.mxu0 %v1750_v5  ;;  %822 = vmatprep.subr.bf16.mxu1 %v1755_v7 }
 0x324   :  { %811 = vmatprep.mubr.bf16.mxu0 %v1685_v0  ;;  %852 = vmatprep.mubr.bf16.mxu1 %v1685_v0 }
 0x326   :  { %782 = vmatpush1.bf16.msra.mxu0 %v1752_v6  ;;  %823 = vmatpush1.bf16.msra.mxu1 %v1759_v8 }
 0x327   :  { %783 = vmatprep.subr.bf16.mxu0 %v1762_v9  ;;  %824 = vmatprep.subr.bf16.mxu1 %v1767_v11 }
 0x32a   :  { %784 = vmatpush1.bf16.msra.mxu0 %v1765_v10  ;;  %825 = vmatpush1.bf16.msra.mxu1 %v1773_v13 }
 0x32b   :  { %785 = vmatprep.subr.bf16.mxu0 %v1770_v12  ;;  %826 = vmatprep.subr.bf16.mxu1 %v1776_v14 }
 0x32e   :  { %786 = vmatpush1.bf16.msra.mxu0 %v1779_v15  ;;  %827 = vmatpush1.bf16.msra.mxu1 %v1785_v17 }
 0x32f   :  { %787 = vmatprep.subr.bf16.mxu0 %v1782_v16  ;;  %828 = vmatprep.subr.bf16.mxu1 %v1788_v18 }
 0x332   :  { %788 = vmatpush1.bf16.msra.mxu0 %v1791_v19  ;;  %829 = vmatpush1.bf16.msra.mxu1 %v1797_v21 }
 0x333   :  { %789 = vmatprep.subr.bf16.mxu0 %v1794_v20  ;;  %830 = vmatprep.subr.bf16.mxu1 %v1800_v22 }
 0x336   :  { %790 = vmatpush1.bf16.msra.mxu0 %v1803_v23  ;;  %831 = vmatpush1.bf16.msra.mxu1 %v1809_v25 }
 0x337   :  { %791 = vmatprep.subr.bf16.mxu0 %v1806_v24  ;;  %832 = vmatprep.subr.bf16.mxu1 %v1812_v26 }
 0x33a   :  { %792 = vmatpush1.bf16.msra.mxu0 %v1815_v27  ;;  %833 = vmatpush1.bf16.msra.mxu1 %v1821_v29 }
 0x33b   :  { %793 = vmatprep.subr.bf16.mxu0 %v1818_v28  ;;  %834 = vmatprep.subr.bf16.mxu1 %v1824_v30 }
 0x33e   :  { %794 = vmatpush1.bf16.msra.mxu0 %v1827_v31  ;;  %835 = vmatpush1.bf16.msra.mxu1 %v1831_v33 }
 0x33f   :  { %898 = vmatprep.subr.bf16.mxu0 %v1740_v1  ;;  %939 = vmatprep.subr.bf16.mxu1 %v1745_v3 }
 0x3e1   :  { %v695_v57 = vpop.f32.mrf.mxu0  ;;  %v736_v59 = vpop.f32.mrf.mxu1 }
 0x3e2   :  { %v743_v60 = vadd.f32 %v695_v57, %v656_v55  ;;  %v745_v41 = vadd.f32 %v736_v59, %v658_v32  ;;  %v773_v32 = vld [vmem:[#allocation4 + $0x48] sm:$0xff] }
 0x3e3   :  { %v697_v61 = vpop.f32.mrf.mxu0  ;;  %v738_v62 = vpop.f32.mrf.mxu1 }
 0x3e4   :  { %v747_v63 = vmul.f32 0.5, %v743_v60  ;;  %v744_v34 = vadd.f32 %v697_v61, %v657_v56  ;;  %v746_v44 = vadd.f32 %v738_v62, %v659_v43 }
 0x3e5   :  { %v699_v36 = vpop.f32.mrf.mxu0  ;;  %v740_v38 = vpop.f32.mrf.mxu1 }
 0x3e6   :  { %1447 = vtanh.f32 %v747_v63  ;;  %v751_v37 = vmul.f32 0.5, %v744_v34  ;;  %v756_v45 = vmul.f32 0.5, %v746_v44 }
 0x3e7   :  { %v700_v39 = vpop.f32.mrf.mxu0  ;;  %v741_v40 = vpop.f32.mrf.mxu1 }
 0x3e8   :  { %1449 = vtanh.f32 %v751_v37  ;;  %v776_v40 = vunpack.c.l.bf16 %v773_v32 }
 0x3e9   :  { %1451 = vtanh.f32 %v745_v41 }
 0x3ea   :  { %1453 = vtanh.f32 %v756_v45 }
 0x3f3   :  { %v1448_v46 = vpop.eup %1447 }
 0x3f4   :  { %v749_v47 = vmul.f32 0.5, %v1448_v46 }
 0x3f5   :  { %v1450_v48 = vpop.eup %1449 }
 0x3f6   :  { %v750_v49 = vadd.f32 0.5, %v749_v47  ;;  %v753_v50 = vmul.f32 0.5, %v1450_v48  ;;  %v1452_v52 = vpop.eup %1451 }
 0x3f7   :  { %v1454_v55 = vpop.eup %1453 }
 0x3f8   :  { %v754_v51 = vadd.f32 0.5, %v753_v50  ;;  %v761_v54 = vmul.f32 %v1452_v52, %v750_v49  ;;  %v758_v56 = vmul.f32 0.5, %v1454_v55 }
 0x3fa   :  { %v760_v53 = vmul.f32 %v754_v51, %v1948_v35  ;;  %v759_v57 = vadd.f32 0.5, %v758_v56  ;;  %v772_v35 = vld [vmem:[#allocation4 + $0x40] sm:$0xff] }
 0x3fb   :  { %v774_v61 = vunpack.c.l.bf16 %v772_v35  ;;  %v775_v62 = vunpack.c.h.bf16 %v772_v35 }
 0x3fc   :  { %v1986_v42 = vadd.f32 %v761_v54, %v760_v53 }
 0x3fe   :  { %1455 = vtanh.f32 %v1986_v42 }
 0x40b   :  { %v1456_v58 = vpop.eup %1455 }
 0x40c   :  { %v764_v59 = vmul.f32 %v1456_v58, %v759_v57 }
 0x40e   :  { %767 = vst [vmem:[#allocation12 + $0x18] sm:$0xff] %v764_v59  ;;  %v778_v60 = vpack.c.bf16 %v764_v59, %v764_v59 }
 0x410   :  { %812 = vmatmul.mubr.bf16.vlgmr.msra.gmra.mxu0 %v778_v60  ;;  %853 = vmatmul.mubr.bf16.vlgmr.msra.gmra.mxu1 %v778_v60 }
 0x411   :  { %899 = vmatpush1.bf16.msra.mxu0 %v1742_v2  ;;  %940 = vmatpush1.bf16.msra.mxu1 %v1747_v4 }
 0x412   :  { %900 = vmatprep.subr.bf16.mxu0 %v1750_v5  ;;  %941 = vmatprep.subr.bf16.mxu1 %v1755_v7 }
 0x413   :  { %930 = vmatprep.mubr.bf16.mxu0 %v1685_v0  ;;  %971 = vmatprep.mubr.bf16.mxu1 %v1685_v0 }
 0x415   :  { %901 = vmatpush1.bf16.msra.mxu0 %v1752_v6  ;;  %942 = vmatpush1.bf16.msra.mxu1 %v1759_v8 }
 0x416   :  { %902 = vmatprep.subr.bf16.mxu0 %v1762_v9  ;;  %943 = vmatprep.subr.bf16.mxu1 %v1767_v11 }
 0x419   :  { %903 = vmatpush1.bf16.msra.mxu0 %v1765_v10  ;;  %944 = vmatpush1.bf16.msra.mxu1 %v1773_v13 }
 0x41a   :  { %904 = vmatprep.subr.bf16.mxu0 %v1770_v12  ;;  %945 = vmatprep.subr.bf16.mxu1 %v1776_v14 }
 0x41d   :  { %905 = vmatpush1.bf16.msra.mxu0 %v1779_v15  ;;  %946 = vmatpush1.bf16.msra.mxu1 %v1785_v17 }
 0x41e   :  { %906 = vmatprep.subr.bf16.mxu0 %v1782_v16  ;;  %947 = vmatprep.subr.bf16.mxu1 %v1788_v18 }
 0x421   :  { %907 = vmatpush1.bf16.msra.mxu0 %v1791_v19  ;;  %948 = vmatpush1.bf16.msra.mxu1 %v1797_v21 }
 0x422   :  { %908 = vmatprep.subr.bf16.mxu0 %v1794_v20  ;;  %949 = vmatprep.subr.bf16.mxu1 %v1800_v22 }
 0x425   :  { %909 = vmatpush1.bf16.msra.mxu0 %v1803_v23  ;;  %950 = vmatpush1.bf16.msra.mxu1 %v1809_v25 }
 0x426   :  { %910 = vmatprep.subr.bf16.mxu0 %v1806_v24  ;;  %951 = vmatprep.subr.bf16.mxu1 %v1812_v26 }
 0x429   :  { %911 = vmatpush1.bf16.msra.mxu0 %v1815_v27  ;;  %952 = vmatpush1.bf16.msra.mxu1 %v1821_v29 }
 0x42a   :  { %912 = vmatprep.subr.bf16.mxu0 %v1818_v28  ;;  %953 = vmatprep.subr.bf16.mxu1 %v1824_v30 }
 0x42d   :  { %913 = vmatpush1.bf16.msra.mxu0 %v1827_v31  ;;  %954 = vmatpush1.bf16.msra.mxu1 %v1831_v33 }
 0x42e   :  { %1017 = vmatprep.subr.bf16.mxu0 %v1740_v1  ;;  %1058 = vmatprep.subr.bf16.mxu1 %v1745_v3  ;;  %v777_v3 = vunpack.c.h.bf16 %v773_v32 }
 0x4d0   :  { %v813_v63 = vpop.f32.mrf.mxu0  ;;  %v854_v34 = vpop.f32.mrf.mxu1 }
 0x4d1   :  { %v861_v36 = vadd.f32 %v813_v63, %v774_v61  ;;  %v863_v47 = vadd.f32 %v854_v34, %v776_v40 }
 0x4d2   :  { %v815_v38 = vpop.f32.mrf.mxu0  ;;  %v856_v37 = vpop.f32.mrf.mxu1 }
 0x4d3   :  { %v865_v39 = vmul.f32 0.5, %v861_v36  ;;  %v862_v41 = vadd.f32 %v815_v38, %v775_v62  ;;  %v864_v48 = vadd.f32 %v856_v37, %v777_v3  ;;  %v1504_v3 = vld [vmem:[#allocation7 + $0xc8] ss:$16 sps:$4 sm:$0xff]  }
 0x4d4   :  { %v817_v43 = vpop.f32.mrf.mxu0  ;;  %v858_v44 = vpop.f32.mrf.mxu1 }
 0x4d5   :  { %1457 = vtanh.f32 %v865_v39  ;;  %v869_v45 = vmul.f32 0.5, %v862_v41  ;;  %v874_v49 = vmul.f32 0.5, %v864_v48  ;;  %v1499_v44 = vld [vmem:[#allocation7 + $0xe0] ss:$16 sps:$4 sm:$0xff]   ;;  %v1505_v48 = vld [vmem:[#allocation7 + $0xa4] ss:$16 sps:$4 sm:$0xff]  }
 0x4d6   :  { %v818_v46 = vpop.f32.mrf.mxu0  ;;  %v859_v1 = vpop.f32.mrf.mxu1 }
 0x4d7   :  { %1459 = vtanh.f32 %v869_v45  ;;  %v1500_v45 = vld [vmem:[#allocation7 + $0xe8] ss:$16 sps:$4 sm:$0xff]   ;;  %v1501_v46 = vld [vmem:[#allocation7 + $0xc4] ss:$16 sps:$4 sm:$0xff]   ;;  %v1502_v1 = vld [vmem:[#allocation7 + $0xcc] ss:$16 sps:$4 sm:$0xff]  }
 0x4d8   :  { %1461 = vtanh.f32 %v863_v47  ;;  %v1503_v47 = vld [vmem:[#allocation7 + $0xc0] ss:$16 sps:$4 sm:$0xff]  }
 0x4d9   :  { %1463 = vtanh.f32 %v874_v49  ;;  %v1506_v49 = vld [vmem:[#allocation7 + $0xac] ss:$16 sps:$4 sm:$0xff]  }
 0x4e2   :  { %v1458_v50 = vpop.eup %1457 }
 0x4e3   :  { %v867_v51 = vmul.f32 0.5, %v1458_v50  ;;  %v1507_v50 = vld [vmem:[#allocation7 + $0xa0] ss:$16 sps:$4 sm:$0xff]  }
 0x4e4   :  { %v1460_v52 = vpop.eup %1459 }
 0x4e5   :  { %v868_v53 = vadd.f32 0.5, %v867_v51  ;;  %v871_v54 = vmul.f32 0.5, %v1460_v52  ;;  %v1462_v56 = vpop.eup %1461  ;;  %v1508_v51 = vld [vmem:[#allocation7 + $0xa8] ss:$16 sps:$4 sm:$0xff]   ;;  %v1509_v52 = vld [vmem:[#allocation7 + $0x84] ss:$16 sps:$4 sm:$0xff]  }
 0x4e6   :  { %v1464_v60 = vpop.eup %1463 }
 0x4e7   :  { %v872_v55 = vadd.f32 0.5, %v871_v54  ;;  %v879_v58 = vmul.f32 %v1462_v56, %v868_v53  ;;  %v876_v35 = vmul.f32 0.5, %v1464_v60  ;;  %v1510_v53 = vld [vmem:[#allocation7 + $0x8c] ss:$16 sps:$4 sm:$0xff]   ;;  %v1511_v54 = vld [vmem:[#allocation7 + $0x80] ss:$16 sps:$4 sm:$0xff]  }
 0x4e8   :  { %v1514_v56 = vld [vmem:[#allocation7 + $0x6c] ss:$16 sps:$4 sm:$0xff]  }
 0x4e9   :  { %v878_v57 = vmul.f32 %v872_v55, %v1986_v42  ;;  %v877_v61 = vadd.f32 0.5, %v876_v35  ;;  %v1512_v55 = vld [vmem:[#allocation7 + $0x88] ss:$16 sps:$4 sm:$0xff]   ;;  %v1518_v60 = vld [vmem:[#allocation7 + $0x4c] ss:$16 sps:$4 sm:$0xff]  }
 0x4ea   :  { %v1519_v35 = vld [vmem:[#allocation7 + $0x40] ss:$16 sps:$4 sm:$0xff]  }
 0x4eb   :  { %v2024_v59 = vadd.f32 %v879_v58, %v878_v57  ;;  %v1515_v57 = vld [vmem:[#allocation7 + $0x60] ss:$16 sps:$4 sm:$0xff]   ;;  %v1516_v58 = vld [vmem:[#allocation7 + $0x68] ss:$16 sps:$4 sm:$0xff]  }
 0x4ed   :  { %1465 = vtanh.f32 %v2024_v59 }
 0x4fa   :  { %v1466_v62 = vpop.eup %1465 }
 0x4fb   :  { %v882_v63 = vmul.f32 %v1466_v62, %v877_v61  ;;  %v1520_v61 = vld [vmem:[#allocation7 + $0x48] ss:$16 sps:$4 sm:$0xff]   ;;  %v1521_v62 = vld [vmem:[#allocation7 + $0x24] ss:$16 sps:$4 sm:$0xff]  }
 0x4fd   :  { %885 = vst [vmem:[#allocation12 + $0x20] sm:$0xff] %v882_v63  ;;  %v897_v32 = vpack.c.bf16 %v882_v63, %v882_v63  ;;  %v1522_v63 = vld [vmem:[#allocation7 + $0x2c] ss:$16 sps:$4 sm:$0xff]  }
 0x4ff   :  { %931 = vmatmul.mubr.bf16.vlgmr.msra.gmra.mxu0 %v897_v32  ;;  %972 = vmatmul.mubr.bf16.vlgmr.msra.gmra.mxu1 %v897_v32  ;;  %v1523_v32 = vld [vmem:[#allocation7 + $0x20] ss:$16 sps:$4 sm:$0xff]  }
 0x500   :  { %1018 = vmatpush1.bf16.msra.mxu0 %v1742_v2  ;;  %1059 = vmatpush1.bf16.msra.mxu1 %v1747_v4  ;;  %v1497_v2 = vld [vmem:[#allocation7 + $0xe4] ss:$16 sps:$4 sm:$0xff]   ;;  %v1498_v4 = vld [vmem:[#allocation7 + $0xec] ss:$16 sps:$4 sm:$0xff]  }
 0x501   :  { %1019 = vmatprep.subr.bf16.mxu0 %v1750_v5  ;;  %1060 = vmatprep.subr.bf16.mxu1 %v1755_v7  ;;  %v891_v5 = vld [vmem:[#allocation4 + $0x50] sm:$0xff] }
 0x502   :  { %1049 = vmatprep.mubr.bf16.mxu0 %v1685_v0  ;;  %1090 = vmatprep.mubr.bf16.mxu1 %v1685_v0  ;;  %v894_v7 = vunpack.c.h.bf16 %v891_v5 }
 0x504   :  { %1020 = vmatpush1.bf16.msra.mxu0 %v1752_v6  ;;  %1061 = vmatpush1.bf16.msra.mxu1 %v1759_v8  ;;  %v893_v6 = vunpack.c.l.bf16 %v891_v5  ;;  %v1526_v5 = vld [vmem:[#allocation7 + $0xc] ss:$16 sps:$4 sm:$0xff]  }
 0x505   :  { %1021 = vmatprep.subr.bf16.mxu0 %v1762_v9  ;;  %1062 = vmatprep.subr.bf16.mxu1 %v1767_v11  ;;  %v892_v9 = vld [vmem:[#allocation4 + $0x58] sm:$0xff] }
 0x508   :  { %1022 = vmatpush1.bf16.msra.mxu0 %v1765_v10  ;;  %1063 = vmatpush1.bf16.msra.mxu1 %v1773_v13 }
 0x509   :  { %1023 = vmatprep.subr.bf16.mxu0 %v1770_v12  ;;  %1064 = vmatprep.subr.bf16.mxu1 %v1776_v14 }
 0x50c   :  { %1024 = vmatpush1.bf16.msra.mxu0 %v1779_v15  ;;  %1065 = vmatpush1.bf16.msra.mxu1 %v1785_v17  ;;  %v895_v15 = vunpack.c.l.bf16 %v892_v9 }
 0x50d   :  { %1025 = vmatprep.subr.bf16.mxu0 %v1782_v16  ;;  %1066 = vmatprep.subr.bf16.mxu1 %v1788_v18 }
 0x510   :  { %1026 = vmatpush1.bf16.msra.mxu0 %v1791_v19  ;;  %1067 = vmatpush1.bf16.msra.mxu1 %v1797_v21 }
 0x511   :  { %1027 = vmatprep.subr.bf16.mxu0 %v1794_v20  ;;  %1068 = vmatprep.subr.bf16.mxu1 %v1800_v22 }
 0x514   :  { %1028 = vmatpush1.bf16.msra.mxu0 %v1803_v23  ;;  %1069 = vmatpush1.bf16.msra.mxu1 %v1809_v25  ;;  %v896_v23 = vunpack.c.h.bf16 %v892_v9 }
 0x515   :  { %1029 = vmatprep.subr.bf16.mxu0 %v1806_v24  ;;  %1070 = vmatprep.subr.bf16.mxu1 %v1812_v26 }
 0x518   :  { %1030 = vmatpush1.bf16.msra.mxu0 %v1815_v27  ;;  %1071 = vmatpush1.bf16.msra.mxu1 %v1821_v29 }
 0x519   :  { %1031 = vmatprep.subr.bf16.mxu0 %v1818_v28  ;;  %1072 = vmatprep.subr.bf16.mxu1 %v1824_v30 }
 0x51c   :  { %1032 = vmatpush1.bf16.msra.mxu0 %v1827_v31  ;;  %1073 = vmatpush1.bf16.msra.mxu1 %v1831_v33 }
 0x51d   :  { %1136 = vmatprep.subr.bf16.mxu0 %v1497_v2  ;;  %1177 = vmatprep.subr.bf16.mxu1 %v1498_v4  ;;  %v1524_v2 = vld [vmem:[#allocation7 + $0x28] ss:$16 sps:$4 sm:$0xff]   ;;  %v1525_v4 = vld [vmem:[#allocation7 + $0x4] ss:$16 sps:$4 sm:$0xff]  }
 0x5bf   :  { %v932_v8 = vpop.f32.mrf.mxu0  ;;  %v973_v10 = vpop.f32.mrf.mxu1 }
 0x5c0   :  { %v980_v11 = vadd.f32 %v932_v8, %v893_v6  ;;  %v982_v22 = vadd.f32 %v973_v10, %v895_v15  ;;  %v1527_v6 = vld [vmem:[#allocation7] ss:$16 sps:$4 sm:$0xff]  }
 0x5c1   :  { %v934_v12 = vpop.f32.mrf.mxu0  ;;  %v975_v13 = vpop.f32.mrf.mxu1  ;;  %v1010_v8 = vld [vmem:[#allocation4 + $0x60] sm:$0xff] }
 0x5c2   :  { %v984_v14 = vmul.f32 0.5, %v980_v11  ;;  %v981_v16 = vadd.f32 %v934_v12, %v894_v7  ;;  %v983_v24 = vadd.f32 %v975_v13, %v896_v23  ;;  %v1528_v7 = vld [vmem:[#allocation7 + $0x8] ss:$16 sps:$4 sm:$0xff]   ;;  %v1012_v9 = vunpack.c.l.bf16 %v1010_v8 }
 0x5c3   :  { %v936_v17 = vpop.f32.mrf.mxu0  ;;  %v977_v18 = vpop.f32.mrf.mxu1  ;;  %v1013_v10 = vunpack.c.h.bf16 %v1010_v8  ;;  %v1011_v12 = vld [vmem:[#allocation4 + $0x68] sm:$0xff] }
 0x5c4   :  { %1467 = vtanh.f32 %v984_v14  ;;  %v988_v19 = vmul.f32 0.5, %v981_v16  ;;  %v993_v25 = vmul.f32 0.5, %v983_v24  ;;  %v1014_v18 = vunpack.c.l.bf16 %v1011_v12 }
 0x5c5   :  { %v937_v20 = vpop.f32.mrf.mxu0  ;;  %v978_v21 = vpop.f32.mrf.mxu1 }
 0x5c6   :  { %1469 = vtanh.f32 %v988_v19 }
 0x5c7   :  { %1471 = vtanh.f32 %v982_v22 }
 0x5c8   :  { %1473 = vtanh.f32 %v993_v25 }
 0x5d1   :  { %v1468_v26 = vpop.eup %1467 }
 0x5d2   :  { %v986_v27 = vmul.f32 0.5, %v1468_v26  ;;  %v1015_v26 = vunpack.c.h.bf16 %v1011_v12 }
 0x5d3   :  { %v1470_v28 = vpop.eup %1469 }
 0x5d4   :  { %v987_v29 = vadd.f32 0.5, %v986_v27  ;;  %v990_v30 = vmul.f32 0.5, %v1470_v28  ;;  %v1472_v33 = vpop.eup %1471 }
 0x5d5   :  { %v1474_v38 = vpop.eup %1473 }
 0x5d6   :  { %v991_v31 = vadd.f32 0.5, %v990_v30  ;;  %v998_v34 = vmul.f32 %v1472_v33, %v987_v29  ;;  %v995_v37 = vmul.f32 0.5, %v1474_v38 }
 0x5d8   :  { %v997_v42 = vmul.f32 %v991_v31, %v2024_v59  ;;  %v996_v39 = vadd.f32 0.5, %v995_v37  ;;  %v1517_v59 = vld [vmem:[#allocation7 + $0x44] ss:$16 sps:$4 sm:$0xff]  }
 0x5da   :  { %v2060_v36 = vadd.f32 %v998_v34, %v997_v42 }
 0x5dc   :  { %1475 = vtanh.f32 %v2060_v36 }
 0x5e9   :  { %v1476_v40 = vpop.eup %1475 }
 0x5ea   :  { %v1001_v41 = vmul.f32 %v1476_v40, %v996_v39 }
 0x5ec   :  { %1004 = vst [vmem:[#allocation12 + $0x28] sm:$0xff] %v1001_v41  ;;  %v1016_v43 = vpack.c.bf16 %v1001_v41, %v1001_v41 }
 0x5ee   :  { %1050 = vmatmul.mubr.bf16.vlgmr.msra.gmra.mxu0 %v1016_v43  ;;  %1091 = vmatmul.mubr.bf16.vlgmr.msra.gmra.mxu1 %v1016_v43 }
 0x5ef   :  { %1137 = vmatpush1.bf16.msra.mxu0 %v1499_v44  ;;  %1178 = vmatpush1.bf16.msra.mxu1 %v1500_v45 }
 0x5f0   :  { %1138 = vmatprep.subr.bf16.mxu0 %v1501_v46  ;;  %1179 = vmatprep.subr.bf16.mxu1 %v1502_v1 }
 0x5f1   :  { %1168 = vmatprep.mubr.bf16.mxu0 %v1685_v0  ;;  %1209 = vmatprep.mubr.bf16.mxu1 %v1685_v0  ;;  %v1513_v0 = vld [vmem:[#allocation7 + $0x64] ss:$16 sps:$4 sm:$0xff]  }
 0x5f3   :  { %1139 = vmatpush1.bf16.msra.mxu0 %v1503_v47  ;;  %1180 = vmatpush1.bf16.msra.mxu1 %v1504_v3  ;;  %v1129_v47 = vld [vmem:[#allocation4 + $0x70] sm:$0xff] }
 0x5f4   :  { %1140 = vmatprep.subr.bf16.mxu0 %v1505_v48  ;;  %1181 = vmatprep.subr.bf16.mxu1 %v1506_v49  ;;  %v1131_v3 = vunpack.c.l.bf16 %v1129_v47  ;;  %v1132_v48 = vunpack.c.h.bf16 %v1129_v47 }
 0x5f7   :  { %1141 = vmatpush1.bf16.msra.mxu0 %v1507_v50  ;;  %1182 = vmatpush1.bf16.msra.mxu1 %v1508_v51  ;;  %v1130_v50 = vld [vmem:[#allocation4 + $0x78] sm:$0xff] }
 0x5f8   :  { %1142 = vmatprep.subr.bf16.mxu0 %v1509_v52  ;;  %1183 = vmatprep.subr.bf16.mxu1 %v1510_v53 }
 0x5fb   :  { %1143 = vmatpush1.bf16.msra.mxu0 %v1511_v54  ;;  %1184 = vmatpush1.bf16.msra.mxu1 %v1512_v55  ;;  %v1133_v55 = vunpack.c.l.bf16 %v1130_v50 }
 0x5fc   :  { %1144 = vmatprep.subr.bf16.mxu0 %v1513_v0  ;;  %1185 = vmatprep.subr.bf16.mxu1 %v1514_v56 }
 0x5ff   :  { %1145 = vmatpush1.bf16.msra.mxu0 %v1515_v57  ;;  %1186 = vmatpush1.bf16.msra.mxu1 %v1516_v58 }
 0x600   :  { %1146 = vmatprep.subr.bf16.mxu0 %v1517_v59  ;;  %1187 = vmatprep.subr.bf16.mxu1 %v1518_v60 }
 0x603   :  { %1147 = vmatpush1.bf16.msra.mxu0 %v1519_v35  ;;  %1188 = vmatpush1.bf16.msra.mxu1 %v1520_v61  ;;  %v1134_v61 = vunpack.c.h.bf16 %v1130_v50 }
 0x604   :  { %1148 = vmatprep.subr.bf16.mxu0 %v1521_v62  ;;  %1189 = vmatprep.subr.bf16.mxu1 %v1522_v63 }
 0x607   :  { %1149 = vmatpush1.bf16.msra.mxu0 %v1523_v32  ;;  %1190 = vmatpush1.bf16.msra.mxu1 %v1524_v2 }
 0x608   :  { %1150 = vmatprep.subr.bf16.mxu0 %v1525_v4  ;;  %1191 = vmatprep.subr.bf16.mxu1 %v1526_v5 }
 0x60b   :  { %1151 = vmatpush1.bf16.msra.mxu0 %v1527_v6  ;;  %1192 = vmatpush1.bf16.msra.mxu1 %v1528_v7 }
 0x6ae   :  { %v1051_v11 = vpop.f32.mrf.mxu0  ;;  %v1092_v13 = vpop.f32.mrf.mxu1 }
 0x6af   :  { %v1099_v14 = vadd.f32 %v1051_v11, %v1012_v9  ;;  %v1101_v25 = vadd.f32 %v1092_v13, %v1014_v18 }
 0x6b0   :  { %v1053_v15 = vpop.f32.mrf.mxu0  ;;  %v1094_v16 = vpop.f32.mrf.mxu1 }
 0x6b1   :  { %v1103_v17 = vmul.f32 0.5, %v1099_v14  ;;  %v1100_v19 = vadd.f32 %v1053_v15, %v1013_v10  ;;  %v1102_v27 = vadd.f32 %v1094_v16, %v1015_v26 }
 0x6b2   :  { %v1055_v20 = vpop.f32.mrf.mxu0  ;;  %v1096_v21 = vpop.f32.mrf.mxu1 }
 0x6b3   :  { %1477 = vtanh.f32 %v1103_v17  ;;  %v1107_v22 = vmul.f32 0.5, %v1100_v19  ;;  %v1112_v28 = vmul.f32 0.5, %v1102_v27 }
 0x6b4   :  { %v1056_v23 = vpop.f32.mrf.mxu0  ;;  %v1097_v24 = vpop.f32.mrf.mxu1 }
 0x6b5   :  { %1479 = vtanh.f32 %v1107_v22 }
 0x6b6   :  { %1481 = vtanh.f32 %v1101_v25 }
 0x6b7   :  { %1483 = vtanh.f32 %v1112_v28 }
 0x6c0   :  { %v1478_v29 = vpop.eup %1477 }
 0x6c1   :  { %v1105_v30 = vmul.f32 0.5, %v1478_v29 }
 0x6c2   :  { %v1480_v31 = vpop.eup %1479 }
 0x6c3   :  { %v1106_v33 = vadd.f32 0.5, %v1105_v30  ;;  %v1109_v42 = vmul.f32 0.5, %v1480_v31  ;;  %v1482_v38 = vpop.eup %1481 }
 0x6c4   :  { %v1484_v41 = vpop.eup %1483 }
 0x6c5   :  { %v1110_v34 = vadd.f32 0.5, %v1109_v42  ;;  %v1117_v39 = vmul.f32 %v1482_v38, %v1106_v33  ;;  %v1114_v43 = vmul.f32 0.5, %v1484_v41 }
 0x6c7   :  { %v1116_v37 = vmul.f32 %v1110_v34, %v2060_v36  ;;  %v1115_v44 = vadd.f32 0.5, %v1114_v43 }
 0x6c9   :  { %v1118_v40 = vadd.f32 %v1117_v39, %v1116_v37 }
 0x6cb   :  { %1485 = vtanh.f32 %v1118_v40 }
 0x6d8   :  { %v1486_v45 = vpop.eup %1485 }
 0x6d9   :  { %v1120_v46 = vmul.f32 %v1486_v45, %v1115_v44 }
 0x6db   :  { %1123 = vst [vmem:[#allocation12 + $0x30] sm:$0xff] %v1120_v46  ;;  %v1135_v1 = vpack.c.bf16 %v1120_v46, %v1120_v46 }
 0x6dd   :  { %1169 = vmatmul.mubr.bf16.vlgmr.msra.gmra.mxu0 %v1135_v1  ;;  %1210 = vmatmul.mubr.bf16.vlgmr.msra.gmra.mxu1 %v1135_v1 }
 0x79d   :  { %v1170_v49 = vpop.f32.mrf.mxu0  ;;  %v1211_v51 = vpop.f32.mrf.mxu1 }
 0x79e   :  { %v1218_v52 = vadd.f32 %v1170_v49, %v1131_v3  ;;  %v1220_v35 = vadd.f32 %v1211_v51, %v1133_v55 }
 0x79f   :  { %v1172_v36 = vpop.f32.mrf.mxu0  ;;  %v1213_v53 = vpop.f32.mrf.mxu1 }
 0x7a0   :  { %v1222_v54 = vmul.f32 0.5, %v1218_v52  ;;  %v1219_v0 = vadd.f32 %v1172_v36, %v1132_v48  ;;  %v1221_v62 = vadd.f32 %v1213_v53, %v1134_v61 }
 0x7a1   :  { %v1174_v56 = vpop.f32.mrf.mxu0  ;;  %v1215_v57 = vpop.f32.mrf.mxu1 }
 0x7a2   :  { %1487 = vtanh.f32 %v1222_v54  ;;  %v1226_v58 = vmul.f32 0.5, %v1219_v0  ;;  %v1231_v63 = vmul.f32 0.5, %v1221_v62 }
 0x7a3   :  { %v1175_v59 = vpop.f32.mrf.mxu0  ;;  %v1216_v60 = vpop.f32.mrf.mxu1 }
 0x7a4   :  { %1489 = vtanh.f32 %v1226_v58 }
 0x7a5   :  { %1491 = vtanh.f32 %v1220_v35 }
 0x7a6   :  { %1493 = vtanh.f32 %v1231_v63 }
 0x7af   :  { %v1488_v32 = vpop.eup %1487 }
 0x7b0   :  { %v1224_v2 = vmul.f32 0.5, %v1488_v32 }
 0x7b1   :  { %v1490_v4 = vpop.eup %1489 }
 0x7b2   :  { %v1225_v5 = vadd.f32 0.5, %v1224_v2  ;;  %v1228_v6 = vmul.f32 0.5, %v1490_v4  ;;  %v1492_v8 = vpop.eup %1491 }
 0x7b3   :  { %v1494_v12 = vpop.eup %1493 }
 0x7b4   :  { %v1229_v7 = vadd.f32 0.5, %v1228_v6  ;;  %v1236_v10 = vmul.f32 %v1492_v8, %v1225_v5  ;;  %v1233_v13 = vmul.f32 0.5, %v1494_v12 }
 0x7b6   :  { %v1235_v9 = vmul.f32 %v1229_v7, %v1118_v40  ;;  %v1234_v14 = vadd.f32 0.5, %v1233_v13 }
 0x7b8   :  { %v1237_v11 = vadd.f32 %v1236_v10, %v1235_v9 }
 0x7ba   :  { %1495 = vtanh.f32 %v1237_v11  ;;  %1249 = vst [vmem:[#allocation15] sm:$0xff] %v1237_v11 }
 0x7c7   :  { %v1496_v15 = vpop.eup %1495 }
 0x7c8   :  { %v1239_v16 = vmul.f32 %v1496_v15, %v1234_v14 }
 0x7ca   :  { %1242 = vst [vmem:[#allocation12 + $0x38] sm:$0xff] %v1239_v16  ;;  %1248 = vst [vmem:[#allocation13] sm:$0xff] %v1239_v16 }
 0x7cb   :  { %1620 = shalt.err (!%p1617_p10)
}
 0x7cc   :  { %1278 = dma.vmem_to_hbm [thread:$0]  %s1276_s3, 128, %s2080_s5, [#allocation14]  }
 0x7cd   :  { %s1629_s24 = scalar_lea.vmem %s1263_s18, 1024  ;;  %p1634_p12 = scmp.lt.s32.totalorder %s1263_s18, %s1263_s18 }
 0x7ce   :  { %p1630_p11 = scmp.ne.s32.totalorder %s1263_s18, %s1629_s24  ;;  %p1635_p13 = scmp.lt.s32.totalorder %s1629_s24, %s1629_s24 }
 0x7d0   :  { %p1636_p0 = por %p1635_p13, %p1634_p12 }
 0x7d2   :  { %p1637_p1 = pnand %p1636_p0, %p1630_p11 }
 0x7d4   :  { %1640 = shalt.err (!%p1637_p1)
}
 0x7d5   :  { %s1689_s25 = smov 128   ;;  %s1690_s26 = smov 8  }
 0x7d6   :  { %1268 = dma.vmem_to_hbm [thread:$0]  %s1263_s18, 1024, %s2079_s4, [#allocation6], %s1689_s25, %s1689_s25, %s1690_s26  }
 0x7d7   :  { %s1649_s29 = scalar_lea.vmem %s1286_s20, 128  ;;  %p1654_p3 = scmp.lt.s32.totalorder %s1286_s20, %s1286_s20 }
 0x7d8   :  { %p1650_p2 = scmp.ne.s32.totalorder %s1286_s20, %s1649_s29  ;;  %p1655_p4 = scmp.lt.s32.totalorder %s1649_s29, %s1649_s29 }
 0x7da   :  { %p1656_p5 = por %p1655_p4, %p1654_p3 }
 0x7dc   :  { %p1657_p6 = pnand %p1656_p5, %p1650_p2 }
 0x7de   :  { %1660 = shalt.err (!%p1657_p6)
}
 0x7df   :  { %1288 = dma.vmem_to_hbm [thread:$0]  %s1286_s20, 128, %s2081_s6, [#allocation14]  }
 0x7e0   :  { %1675 = dma.done.wait [#allocation6], 1024  }
 0x7e1   :  { %1676 = vsyncadd [#allocation6], 4294966272 }
 0x7e2   :  { %1677 = dma.done.wait [#allocation14], 256  }
 0x7e3   :  { %1678 = vsyncadd [#allocation14], 4294967040 }
 0x7e4   :  { %1298 = vsyncpa [#allocation5], 1 }
 0x7e5   :  { %1299 = vsyncpa [#allocation8], 1 }
 0x7e6   :  { %1300 = vsyncpa [#allocation11], 1 }
 0x7e7   :  { %1301 = vsyncpa [#allocation6], 1 }
 0x7e8   :  { %1302 = vsyncpa [#allocation14], 1 }

</bundles_post_ra>
